<compile_context>
chip_gen: v6e
topology: v6e:2x2x1
jax: 0.10.0
libtpu: 0.0.40
codegen_flags: <defaults>
</compile_context>

<pallas_src>
import functools

import jax
import jax.numpy as jnp
from jax.experimental import pallas as pl
from jax.experimental.pallas import tpu as pltpu

_LANE = 128


# ---------------------------------------------------------------------------
# Fused per-block kernel: E episodes of inner-loop adaptation + query grad.
#   Inputs  (per grid step i = block index):
#     sx_ref   : (E, N, D)  support features for episodes [i*E, (i+1)*E)
#     scat_ref : (E, N, 1)  int32 support labels
#     qx_ref   : (N, D)     query features   (query_x[0], as in the reference)
#     qcat_ref : (N, 1)     int32 query labels (query_cat[0])
#     w_ref    : (D, CP)    meta weight, classes zero-padded to CP (128-mult)
#     b_ref    : (1, CP)    meta bias, zero-padded
#   Outputs (per grid step i):
#     loss_ref : (1, E, 128)  lane-dense rows; row e = broadcast query loss
#     dw_ref   : (1, D, CP)   block-summed query grad w.r.t. adapted W
#     db_ref   : (1, 1, CP)   block-summed query grad w.r.t. adapted b
# ---------------------------------------------------------------------------
def _meta_block_kernel(sx_ref, scat_ref, qx_ref, qcat_ref, w_ref, b_ref,
                       loss_ref, dw_ref, db_ref, *,
                       num_updates, inner_lr, num_classes):
    sx = sx_ref[...]           # (E, N, D)
    slab = scat_ref[...]       # (E, N, 1) int32
    qx = qx_ref[...]           # (N, D)
    qlab = qcat_ref[...]       # (N, 1) int32
    w0 = w_ref[...]            # (D, CP)
    b0 = b_ref[...]            # (1, CP)

    e, n, d = sx.shape
    cp = w0.shape[1]
    lane = loss_ref.shape[-1]
    inv = 1.0 / (n * num_classes)   # MSE normalizer uses the TRUE class count

    # In-kernel one-hot targets via iota compare (padded classes never match,
    # so padded logits/targets/grads stay exactly zero).
    s_iota = jax.lax.broadcasted_iota(jnp.int32, (e, n, cp), 2)
    sy = (s_iota == slab).astype(jnp.float32)                # (E, N, CP)
    q_iota = jax.lax.broadcasted_iota(jnp.int32, (n, cp), 1)
    qy = (q_iota == qlab).astype(jnp.float32)                # (N, CP)

    # Episode-broadcast copies (hoisted once, outside all loops).
    qx_b = jnp.broadcast_to(qx[None], (e, n, d))
    qy_b = jnp.broadcast_to(qy[None], (e, n, cp))
    w_init = jnp.broadcast_to(w0, (e, d, cp))
    b_init = jnp.broadcast_to(b0, (e, 1, cp))

    def grads(x, y, w, b):
        # logits[e] = x[e] @ w[e] + b[e]    (episode-batched, MXU)
        logits = jax.lax.dot_general(
            x, w, dimension_numbers=(((2,), (1,)), ((0,), (0,))),
            preferred_element_type=jnp.float32) + b
        diff = logits - y                                    # (E, N, CP)
        g = diff * (2.0 * inv)                               # dL/dlogits
        # dW[e] = x[e]^T @ g[e] without materializing the transpose.
        dw = jax.lax.dot_general(
            x, g, dimension_numbers=(((1,), (1,)), ((0,), (0,))),
            preferred_element_type=jnp.float32)              # (E, D, CP)
        db = jnp.sum(g, axis=1, keepdims=True)               # (E, 1, CP)
        return diff, dw, db

    # Inner-loop SGD (lr = inner_lr); adapted params stay in vregs.
    def inner_step(_, carry):
        w, b = carry
        _, dw, db = grads(sx, sy, w, b)
        return (w - inner_lr * dw, b - inner_lr * db)

    w_ad, b_ad = jax.lax.fori_loop(0, num_updates, inner_step,
                                   (w_init, b_init), unroll=True)

    # Query loss + first-order grads w.r.t. the adapted params.
    q_diff, dwq, dbq = grads(qx_b, qy_b, w_ad, b_ad)
    q_sq = q_diff * q_diff
    per_ep = jnp.sum(q_sq, axis=1)                           # (E, CP) lane-dense
    q_loss = jnp.sum(per_ep, axis=1, keepdims=True) * inv    # (E, 1)

    # Lane-dense stores (last dim multiple of 128 -> unmasked full-width vst).
    loss_ref[0] = jnp.broadcast_to(q_loss, (e, lane))
    dw_ref[0] = jnp.sum(dwq, axis=0)                         # (D, CP)
    db_ref[0] = jnp.sum(dbq, axis=0)                         # (1, CP)


# ---------------------------------------------------------------------------
# MetaLearner forward (functional re-expression of the PyTorch module)
# ---------------------------------------------------------------------------
@functools.partial(jax.jit,
                   static_argnames=("num_updates", "inner_lr", "beta"))
def meta_learner_forward(support_x, query_x, support_cat, query_cat,
                         w_meta, b_meta, *, num_updates=3,
                         inner_lr=0.1, beta=1e-3):
    """Returns (accs, new_w_meta, new_b_meta).

    `accs` matches the PyTorch return value: per-episode query losses.
    The new meta params reproduce the `write_grads` Adam side effect
    (first Adam step with zero-initialized moments, eps=1e-8)."""
    mb, n, d = support_x.shape
    c = w_meta.shape[1]
    cp = ((c + _LANE - 1) // _LANE) * _LANE        # classes padded to 128-mult

    # Two-wide grid: one block per TensorCore on v7x, 2 cheap sequential
    # steps on v5e/v6e; each block batches E episodes inside the kernel.
    num_blocks = 2 if (mb >= 2 and mb % 2 == 0) else 1
    e = mb // num_blocks

    # PyTorch code uses query_x[0] / query_cat[0] for every episode.
    qx = query_x[0]
    qcat = query_cat[0].astype(jnp.int32).reshape(n, 1)
    scat = support_cat.astype(jnp.int32).reshape(mb, n, 1)

    # Zero-pad the class dim to 128 lanes (exactly equivalent math; padded
    # grads are identically zero and sliced off below).
    w_pad = jnp.pad(w_meta, ((0, 0), (0, cp - c)))
    b_pad = jnp.pad(b_meta, ((0, 0), (0, cp - c)))

    kernel = functools.partial(_meta_block_kernel,
                               num_updates=num_updates,
                               inner_lr=inner_lr,
                               num_classes=c)

    loss_blk, dw_blk, db_blk = pl.pallas_call(
        kernel,
        grid_spec=pltpu.PrefetchScalarGridSpec(
            num_scalar_prefetch=0,
            grid=(num_blocks,),
            in_specs=[
                pl.BlockSpec((e, n, d), lambda i: (i, 0, 0)),   # support_x block
                pl.BlockSpec((e, n, 1), lambda i: (i, 0, 0)),   # support labels
                pl.BlockSpec((n, d), lambda i: (0, 0)),         # query_x[0]
                pl.BlockSpec((n, 1), lambda i: (0, 0)),         # query_cat[0]
                pl.BlockSpec((d, cp), lambda i: (0, 0)),        # w_meta (padded)
                pl.BlockSpec((1, cp), lambda i: (0, 0)),        # b_meta (padded)
            ],
            out_specs=(
                pl.BlockSpec((1, e, _LANE), lambda i: (i, 0, 0)),  # query losses
                pl.BlockSpec((1, d, cp), lambda i: (i, 0, 0)),     # dW partial
                pl.BlockSpec((1, 1, cp), lambda i: (i, 0, 0)),     # db partial
            ),
        ),
        out_shape=(
            jax.ShapeDtypeStruct((num_blocks, e, _LANE), jnp.float32),
            jax.ShapeDtypeStruct((num_blocks, d, cp), jnp.float32),
            jax.ShapeDtypeStruct((num_blocks, 1, cp), jnp.float32),
        ),
        compiler_params=pltpu.CompilerParams(
            dimension_semantics=("parallel",)),
    )(support_x, scat, qx, qcat, w_pad, b_pad)

    accs = loss_blk[:, :, 0].reshape(mb)            # per-episode query losses
    sum_dw = jnp.sum(dw_blk, axis=0)[:, :c]         # (D, C) summed over episodes
    sum_db = jnp.sum(db_blk, axis=0)[:, :c]         # (1, C)

    # write_grads(): one Adam step (lr=beta) on the meta params using the
    # summed grads. First step with zeroed moments => m_hat=g, v_hat=g^2.
    # TODO(synk): persistent Adam moment state across calls is module state in
    # PyTorch; only the first optimizer step is reproduced here.
    eps = 1e-8
    new_w_meta = w_meta - beta * sum_dw / (jnp.abs(sum_dw) + eps)
    new_b_meta = b_meta - beta * sum_db / (jnp.abs(sum_db) + eps)

    return accs, new_w_meta, new_b_meta


# ---------------------------------------------------------------------------
# Driver
# ---------------------------------------------------------------------------
if __name__ == "__main__":
    META_BS = 8      # meta batch size (episodes); 2 blocks x 4 episodes
    N = 8            # samples per episode (k_shot * n_way style)
    D = 32           # feature dim
    C = 16           # number of classes
    NUM_UPDATES = 3
    BETA = 1e-3

    key = jax.random.PRNGKey(0)
    k1, k2, k3, k4, k5, k6 = jax.random.split(key, 6)

    support_x = jax.random.normal(k1, (META_BS, N, D), dtype=jnp.float32)
    query_x = jax.random.normal(k2, (META_BS, N, D), dtype=jnp.float32)
    support_cat = jax.random.randint(k3, (META_BS, N), 0, C, dtype=jnp.int32)
    query_cat = jax.random.randint(k4, (META_BS, N), 0, C, dtype=jnp.int32)

    # Deterministic meta-network parameter init (the "meta_net" of Learner).
    w_meta = 0.1 * jax.random.normal(k5, (D, C), dtype=jnp.float32)
    b_meta = 0.1 * jax.random.normal(k6, (1, C), dtype=jnp.float32)

    accs, new_w, new_b = meta_learner_forward(
        support_x, query_x, support_cat, query_cat,
        w_meta, b_meta, num_updates=NUM_UPDATES, beta=BETA)

    jax.block_until_ready((accs, new_w, new_b))
    print("KERNEL_OK")
</pallas_src>

<mosaic_0001>
module attributes {stable_mosaic.version = 11 : i64} {
  func.func @_meta_block_kernel(%arg0: i32, %arg1: memref<4x8x32xf32, #tpu.memory_space<vmem>>, %arg2: memref<4x8x1xi32, #tpu.memory_space<vmem>>, %arg3: memref<8x32xf32, #tpu.memory_space<vmem>>, %arg4: memref<8x1xi32, #tpu.memory_space<vmem>>, %arg5: memref<32x128xf32, #tpu.memory_space<vmem>>, %arg6: memref<1x128xf32, #tpu.memory_space<vmem>>, %arg7: memref<1x4x128xf32, #tpu.memory_space<vmem>>, %arg8: memref<1x32x128xf32, #tpu.memory_space<vmem>>, %arg9: memref<1x1x128xf32, #tpu.memory_space<vmem>>) attributes {dimension_semantics = [#tpu.dimension_semantics<parallel>], iteration_bounds = array<i64: 2>, scalar_prefetch = 0 : i64, scratch_operands = 0 : i64, tpu.core_type = #tpu.core_type<tc>, window_params = [{transform_indices = @transform_0, window_bounds = array<i64: 4, 8, 32>}, {transform_indices = @transform_1, window_bounds = array<i64: 4, 8, 1>}, {pipeline_mode = #tpu.pipeline_mode<synchronous>, transform_indices = @transform_2, window_bounds = array<i64: 8, 32>}, {pipeline_mode = #tpu.pipeline_mode<synchronous>, transform_indices = @transform_3, window_bounds = array<i64: 8, 1>}, {pipeline_mode = #tpu.pipeline_mode<synchronous>, transform_indices = @transform_4, window_bounds = array<i64: 32, 128>}, {pipeline_mode = #tpu.pipeline_mode<synchronous>, transform_indices = @transform_5, window_bounds = array<i64: 1, 128>}, {transform_indices = @transform_6, window_bounds = array<i64: 1, 4, 128>}, {transform_indices = @transform_7, window_bounds = array<i64: 1, 32, 128>}, {transform_indices = @transform_8, window_bounds = array<i64: 1, 1, 128>}]} {
    %c0 = arith.constant 0 : index
    %c0_0 = arith.constant 0 : index
    %c0_1 = arith.constant 0 : index
    %0 = vector.load %arg1[%c0, %c0_0, %c0_1] : memref<4x8x32xf32, #tpu.memory_space<vmem>>, vector<4x8x32xf32>
    %c0_2 = arith.constant 0 : index
    %c0_3 = arith.constant 0 : index
    %c0_4 = arith.constant 0 : index
    %1 = vector.load %arg2[%c0_2, %c0_3, %c0_4] : memref<4x8x1xi32, #tpu.memory_space<vmem>>, vector<4x8x1xi32>
    %c0_5 = arith.constant 0 : index
    %c0_6 = arith.constant 0 : index
    %2 = vector.load %arg3[%c0_5, %c0_6] : memref<8x32xf32, #tpu.memory_space<vmem>>, vector<8x32xf32>
    %c0_7 = arith.constant 0 : index
    %c0_8 = arith.constant 0 : index
    %3 = vector.load %arg4[%c0_7, %c0_8] : memref<8x1xi32, #tpu.memory_space<vmem>>, vector<8x1xi32>
    %c0_9 = arith.constant 0 : index
    %c0_10 = arith.constant 0 : index
    %4 = vector.load %arg5[%c0_9, %c0_10] : memref<32x128xf32, #tpu.memory_space<vmem>>, vector<32x128xf32>
    %c0_11 = arith.constant 0 : index
    %c0_12 = arith.constant 0 : index
    %5 = vector.load %arg6[%c0_11, %c0_12] : memref<1x128xf32, #tpu.memory_space<vmem>>, vector<1x128xf32>
    %6 = tpu.iota {dimensions = array<i32: 2>} : vector<4x8x128xi32>
    %7 = vector.broadcast %1 : vector<4x8x1xi32> to vector<4x8x128xi32>
    %8 = arith.cmpi eq, %6, %7 : vector<4x8x128xi32>
    %9 = arith.extui %8 : vector<4x8x128xi1> to vector<4x8x128xi32>
    %10 = arith.sitofp %9 : vector<4x8x128xi32> to vector<4x8x128xf32>
    %11 = tpu.iota {dimensions = array<i32: 1>} : vector<8x128xi32>
    %12 = vector.broadcast %3 : vector<8x1xi32> to vector<8x128xi32>
    %13 = arith.cmpi eq, %11, %12 : vector<8x128xi32>
    %14 = arith.extui %13 : vector<8x128xi1> to vector<8x128xi32>
    %15 = arith.sitofp %14 : vector<8x128xi32> to vector<8x128xf32>
    %16 = vector.shape_cast %2 : vector<8x32xf32> to vector<1x8x32xf32>
    %17 = vector.shape_cast %16 : vector<1x8x32xf32> to vector<1x8x32xf32>
    %18 = vector.broadcast %17 : vector<1x8x32xf32> to vector<4x8x32xf32>
    %19 = vector.shape_cast %15 : vector<8x128xf32> to vector<1x8x128xf32>
    %20 = vector.shape_cast %19 : vector<1x8x128xf32> to vector<1x8x128xf32>
    %21 = vector.broadcast %20 : vector<1x8x128xf32> to vector<4x8x128xf32>
    %22 = vector.shape_cast %4 : vector<32x128xf32> to vector<1x32x128xf32>
    %23 = vector.broadcast %22 : vector<1x32x128xf32> to vector<4x32x128xf32>
    %24 = vector.shape_cast %5 : vector<1x128xf32> to vector<1x1x128xf32>
    %25 = vector.broadcast %24 : vector<1x1x128xf32> to vector<4x1x128xf32>
    %c0_i32 = arith.constant 0 : i32
    %cst = arith.constant dense<0.000000e+00> : vector<4x8x128xf32>
    %26 = tpu.matmul %0, %23, %cst {dimension_numbers = #tpu.dot_dimension_numbers<[2], [1], [1], [2], [0, 0, 0, 1, 1, 2], [0], [0]>} : vector<4x8x32xf32>, vector<4x32x128xf32>, vector<4x8x128xf32> -> vector<4x8x128xf32>
    %27 = vector.broadcast %25 : vector<4x1x128xf32> to vector<4x8x128xf32>
    %28 = arith.addf %26, %27 : vector<4x8x128xf32>
    %29 = arith.subf %28, %10 : vector<4x8x128xf32>
    %cst_13 = arith.constant 1.562500e-02 : f32
    %30 = vector.broadcast %cst_13 : f32 to vector<4x8x128xf32>
    %31 = arith.mulf %29, %30 : vector<4x8x128xf32>
    %cst_14 = arith.constant dense<0.000000e+00> : vector<4x32x128xf32>
    %32 = tpu.matmul %0, %31, %cst_14 {dimension_numbers = #tpu.dot_dimension_numbers<[1], [1], [2], [2], [0, 0, 0, 2, 1, 2], [0], [0]>} : vector<4x8x32xf32>, vector<4x8x128xf32>, vector<4x32x128xf32> -> vector<4x32x128xf32>
    %cst_15 = arith.constant dense<0.000000e+00> : vector<4x128xf32>
    %33 = vector.multi_reduction <add>, %31, %cst_15 [1] : vector<4x8x128xf32> to vector<4x128xf32>
    %34 = vector.shape_cast %33 : vector<4x128xf32> to vector<4x1x128xf32>
    %cst_16 = arith.constant 1.000000e-01 : f32
    %35 = vector.broadcast %cst_16 : f32 to vector<4x32x128xf32>
    %36 = arith.mulf %35, %32 : vector<4x32x128xf32>
    %37 = arith.subf %23, %36 : vector<4x32x128xf32>
    %cst_17 = arith.constant 1.000000e-01 : f32
    %38 = vector.broadcast %cst_17 : f32 to vector<4x1x128xf32>
    %39 = arith.mulf %38, %34 : vector<4x1x128xf32>
    %40 = arith.subf %25, %39 : vector<4x1x128xf32>
    %c1_i32 = arith.constant 1 : i32
    %cst_18 = arith.constant dense<0.000000e+00> : vector<4x8x128xf32>
    %41 = tpu.matmul %0, %37, %cst_18 {dimension_numbers = #tpu.dot_dimension_numbers<[2], [1], [1], [2], [0, 0, 0, 1, 1, 2], [0], [0]>} : vector<4x8x32xf32>, vector<4x32x128xf32>, vector<4x8x128xf32> -> vector<4x8x128xf32>
    %42 = vector.broadcast %40 : vector<4x1x128xf32> to vector<4x8x128xf32>
    %43 = arith.addf %41, %42 : vector<4x8x128xf32>
    %44 = arith.subf %43, %10 : vector<4x8x128xf32>
    %cst_19 = arith.constant 1.562500e-02 : f32
    %45 = vector.broadcast %cst_19 : f32 to vector<4x8x128xf32>
    %46 = arith.mulf %44, %45 : vector<4x8x128xf32>
    %cst_20 = arith.constant dense<0.000000e+00> : vector<4x32x128xf32>
    %47 = tpu.matmul %0, %46, %cst_20 {dimension_numbers = #tpu.dot_dimension_numbers<[1], [1], [2], [2], [0, 0, 0, 2, 1, 2], [0], [0]>} : vector<4x8x32xf32>, vector<4x8x128xf32>, vector<4x32x128xf32> -> vector<4x32x128xf32>
    %cst_21 = arith.constant dense<0.000000e+00> : vector<4x128xf32>
    %48 = vector.multi_reduction <add>, %46, %cst_21 [1] : vector<4x8x128xf32> to vector<4x128xf32>
    %49 = vector.shape_cast %48 : vector<4x128xf32> to vector<4x1x128xf32>
    %cst_22 = arith.constant 1.000000e-01 : f32
    %50 = vector.broadcast %cst_22 : f32 to vector<4x32x128xf32>
    %51 = arith.mulf %50, %47 : vector<4x32x128xf32>
    %52 = arith.subf %37, %51 : vector<4x32x128xf32>
    %cst_23 = arith.constant 1.000000e-01 : f32
    %53 = vector.broadcast %cst_23 : f32 to vector<4x1x128xf32>
    %54 = arith.mulf %53, %49 : vector<4x1x128xf32>
    %55 = arith.subf %40, %54 : vector<4x1x128xf32>
    %c2_i32 = arith.constant 2 : i32
    %cst_24 = arith.constant dense<0.000000e+00> : vector<4x8x128xf32>
    %56 = tpu.matmul %0, %52, %cst_24 {dimension_numbers = #tpu.dot_dimension_numbers<[2], [1], [1], [2], [0, 0, 0, 1, 1, 2], [0], [0]>} : vector<4x8x32xf32>, vector<4x32x128xf32>, vector<4x8x128xf32> -> vector<4x8x128xf32>
    %57 = vector.broadcast %55 : vector<4x1x128xf32> to vector<4x8x128xf32>
    %58 = arith.addf %56, %57 : vector<4x8x128xf32>
    %59 = arith.subf %58, %10 : vector<4x8x128xf32>
    %cst_25 = arith.constant 1.562500e-02 : f32
    %60 = vector.broadcast %cst_25 : f32 to vector<4x8x128xf32>
    %61 = arith.mulf %59, %60 : vector<4x8x128xf32>
    %cst_26 = arith.constant dense<0.000000e+00> : vector<4x32x128xf32>
    %62 = tpu.matmul %0, %61, %cst_26 {dimension_numbers = #tpu.dot_dimension_numbers<[1], [1], [2], [2], [0, 0, 0, 2, 1, 2], [0], [0]>} : vector<4x8x32xf32>, vector<4x8x128xf32>, vector<4x32x128xf32> -> vector<4x32x128xf32>
    %cst_27 = arith.constant dense<0.000000e+00> : vector<4x128xf32>
    %63 = vector.multi_reduction <add>, %61, %cst_27 [1] : vector<4x8x128xf32> to vector<4x128xf32>
    %64 = vector.shape_cast %63 : vector<4x128xf32> to vector<4x1x128xf32>
    %cst_28 = arith.constant 1.000000e-01 : f32
    %65 = vector.broadcast %cst_28 : f32 to vector<4x32x128xf32>
    %66 = arith.mulf %65, %62 : vector<4x32x128xf32>
    %67 = arith.subf %52, %66 : vector<4x32x128xf32>
    %cst_29 = arith.constant 1.000000e-01 : f32
    %68 = vector.broadcast %cst_29 : f32 to vector<4x1x128xf32>
    %69 = arith.mulf %68, %64 : vector<4x1x128xf32>
    %70 = arith.subf %55, %69 : vector<4x1x128xf32>
    %cst_30 = arith.constant dense<0.000000e+00> : vector<4x8x128xf32>
    %71 = tpu.matmul %18, %67, %cst_30 {dimension_numbers = #tpu.dot_dimension_numbers<[2], [1], [1], [2], [0, 0, 0, 1, 1, 2], [0], [0]>} : vector<4x8x32xf32>, vector<4x32x128xf32>, vector<4x8x128xf32> -> vector<4x8x128xf32>
    %72 = vector.broadcast %70 : vector<4x1x128xf32> to vector<4x8x128xf32>
    %73 = arith.addf %71, %72 : vector<4x8x128xf32>
    %74 = arith.subf %73, %21 : vector<4x8x128xf32>
    %cst_31 = arith.constant 1.562500e-02 : f32
    %75 = vector.broadcast %cst_31 : f32 to vector<4x8x128xf32>
    %76 = arith.mulf %74, %75 : vector<4x8x128xf32>
    %cst_32 = arith.constant dense<0.000000e+00> : vector<4x32x128xf32>
    %77 = tpu.matmul %18, %76, %cst_32 {dimension_numbers = #tpu.dot_dimension_numbers<[1], [1], [2], [2], [0, 0, 0, 2, 1, 2], [0], [0]>} : vector<4x8x32xf32>, vector<4x8x128xf32>, vector<4x32x128xf32> -> vector<4x32x128xf32>
    %cst_33 = arith.constant dense<0.000000e+00> : vector<4x128xf32>
    %78 = vector.multi_reduction <add>, %76, %cst_33 [1] : vector<4x8x128xf32> to vector<4x128xf32>
    %79 = vector.shape_cast %78 : vector<4x128xf32> to vector<4x1x128xf32>
    %80 = arith.mulf %74, %74 : vector<4x8x128xf32>
    %cst_34 = arith.constant dense<0.000000e+00> : vector<4x128xf32>
    %81 = vector.multi_reduction <add>, %80, %cst_34 [1] : vector<4x8x128xf32> to vector<4x128xf32>
    %cst_35 = arith.constant dense<0.000000e+00> : vector<4xf32>
    %82 = vector.multi_reduction <add>, %81, %cst_35 [1] : vector<4x128xf32> to vector<4xf32>
    %83 = vector.shape_cast %82 : vector<4xf32> to vector<4x1xf32>
    %cst_36 = arith.constant 7.812500e-03 : f32
    %84 = vector.broadcast %cst_36 : f32 to vector<4x1xf32>
    %85 = arith.mulf %83, %84 : vector<4x1xf32>
    %86 = vector.shape_cast %85 : vector<4x1xf32> to vector<4x1xf32>
    %87 = vector.broadcast %86 : vector<4x1xf32> to vector<4x128xf32>
    %c0_37 = arith.constant 0 : index
    %c0_38 = arith.constant 0 : index
    %c0_39 = arith.constant 0 : index
    %88 = vector.load %arg7[%c0_37, %c0_38, %c0_39] : memref<1x4x128xf32, #tpu.memory_space<vmem>>, vector<1x4x128xf32>
    %89 = vector.shape_cast %88 : vector<1x4x128xf32> to vector<4x128xf32>
    %90 = vector.shape_cast %87 : vector<4x128xf32> to vector<1x4x128xf32>
    tpu.vector_store %arg7[%c0_37, %c0_38, %c0_39], %90 {strides = array<i32>} : memref<1x4x128xf32, #tpu.memory_space<vmem>>, vector<1x4x128xf32>,
    %cst_40 = arith.constant dense<0.000000e+00> : vector<32x128xf32>
    %91 = vector.multi_reduction <add>, %77, %cst_40 [0] : vector<4x32x128xf32> to vector<32x128xf32>
    %c0_41 = arith.constant 0 : index
    %c0_42 = arith.constant 0 : index
    %c0_43 = arith.constant 0 : index
    %92 = vector.load %arg8[%c0_41, %c0_42, %c0_43] : memref<1x32x128xf32, #tpu.memory_space<vmem>>, vector<1x32x128xf32>
    %93 = vector.shape_cast %92 : vector<1x32x128xf32> to vector<32x128xf32>
    %94 = vector.shape_cast %91 : vector<32x128xf32> to vector<1x32x128xf32>
    tpu.vector_store %arg8[%c0_41, %c0_42, %c0_43], %94 {strides = array<i32>} : memref<1x32x128xf32, #tpu.memory_space<vmem>>, vector<1x32x128xf32>,
    %cst_44 = arith.constant dense<0.000000e+00> : vector<1x128xf32>
    %95 = vector.multi_reduction <add>, %79, %cst_44 [0] : vector<4x1x128xf32> to vector<1x128xf32>
    %c0_45 = arith.constant 0 : index
    %c0_46 = arith.constant 0 : index
    %c0_47 = arith.constant 0 : index
    %96 = vector.load %arg9[%c0_45, %c0_46, %c0_47] : memref<1x1x128xf32, #tpu.memory_space<vmem>>, vector<1x1x128xf32>
    %97 = vector.shape_cast %96 : vector<1x1x128xf32> to vector<1x128xf32>
    %98 = vector.shape_cast %95 : vector<1x128xf32> to vector<1x1x128xf32>
    tpu.vector_store %arg9[%c0_45, %c0_46, %c0_47], %98 {strides = array<i32>} : memref<1x1x128xf32, #tpu.memory_space<vmem>>, vector<1x1x128xf32>,
    return
  }
  func.func @transform_0(%arg0: i32) -> (i32, i32, i32) {
    %c0_i32 = arith.constant 0 : i32
    %c0_i32_0 = arith.constant 0 : i32
    %c0_i32_1 = arith.constant 0 : i32
    return %arg0, %c0_i32, %c0_i32_0 : i32, i32, i32
  }
  func.func @transform_1(%arg0: i32) -> (i32, i32, i32) {
    %c0_i32 = arith.constant 0 : i32
    %c0_i32_0 = arith.constant 0 : i32
    %c0_i32_1 = arith.constant 0 : i32
    return %arg0, %c0_i32, %c0_i32_0 : i32, i32, i32
  }
  func.func @transform_2(%arg0: i32) -> (i32, i32) {
    %c0_i32 = arith.constant 0 : i32
    %c0_i32_0 = arith.constant 0 : i32
    %c0_i32_1 = arith.constant 0 : i32
    return %c0_i32, %c0_i32_0 : i32, i32
  }
  func.func @transform_3(%arg0: i32) -> (i32, i32) {
    %c0_i32 = arith.constant 0 : i32
    %c0_i32_0 = arith.constant 0 : i32
    %c0_i32_1 = arith.constant 0 : i32
    return %c0_i32, %c0_i32_0 : i32, i32
  }
  func.func @transform_4(%arg0: i32) -> (i32, i32) {
    %c0_i32 = arith.constant 0 : i32
    %c0_i32_0 = arith.constant 0 : i32
    %c0_i32_1 = arith.constant 0 : i32
    return %c0_i32, %c0_i32_0 : i32, i32
  }
  func.func @transform_5(%arg0: i32) -> (i32, i32) {
    %c0_i32 = arith.constant 0 : i32
    %c0_i32_0 = arith.constant 0 : i32
    %c0_i32_1 = arith.constant 0 : i32
    return %c0_i32, %c0_i32_0 : i32, i32
  }
  func.func @transform_6(%arg0: i32) -> (i32, i32, i32) {
    %c0_i32 = arith.constant 0 : i32
    %c0_i32_0 = arith.constant 0 : i32
    %c0_i32_1 = arith.constant 0 : i32
    return %arg0, %c0_i32, %c0_i32_0 : i32, i32, i32
  }
  func.func @transform_7(%arg0: i32) -> (i32, i32, i32) {
    %c0_i32 = arith.constant 0 : i32
    %c0_i32_0 = arith.constant 0 : i32
    %c0_i32_1 = arith.constant 0 : i32
    return %arg0, %c0_i32, %c0_i32_0 : i32, i32, i32
  }
  func.func @transform_8(%arg0: i32) -> (i32, i32, i32) {
    %c0_i32 = arith.constant 0 : i32
    %c0_i32_0 = arith.constant 0 : i32
    %c0_i32_1 = arith.constant 0 : i32
    return %arg0, %c0_i32, %c0_i32_0 : i32, i32, i32
  }
}

</mosaic_0001>

<bundles_post_ra>
// kernel: squeeze.5
= control target key start
LH: loop header
LB: loop body
LE: loop exit
PB: predicated region body
PF: predicated region fallthrough
CT: control target
= control target key end

     0   :  { %s77_s0 = inlined_call_operand.vmem [shape: f32[2,4], index: 0, kind: input, shape index: {}]   ;;  %s78_s1 = inlined_call_operand.hbm [shape: f32[8], index: 1, kind: output, shape index: {}]  }
   0x1   :  { %v6_v0 = vld [vmem:[%s77_s0] sm:$0x3] }
   0x2   :  { %7 = vst [vmem:[#allocation3] sm:$0x3] %v6_v0 }
   0x3   :  { %2 = vsyncpa [#allocation1], 0  ;;  %vm9_vm0 = vcmask 31744   ;;  %s59_s0 = smov 4   ;;  %vm15_vm1 = vcmask 64544   ;;  %s60_s8 = smov [#allocation0]  }
   0x4   :  { %s29_s9 = sshll.u32 %s60_s8, 4  ;;  %s30_s9 = int_to_ptr.vmem [resolvable:$true] %s29_s9 }
   0x5   :  { %s37_s10 = scalar_lea.vmem %s30_s9, 16  ;;  %s41_s11 = scalar_lea.vmem %s30_s9, 32 }
   0x6   :  { %p38_p0 = scmp.ne.s32.totalorder %s30_s9, %s37_s10  ;;  %p42_p1 = scmp.lt.s32.totalorder %s30_s9, %s30_s9 }
   0x7   :  { %p43_p2 = scmp.lt.s32.totalorder %s41_s11, %s37_s10 }
   0x9   :  { %v12_v1 = vld [vmem:[#allocation3 + $0x1] sm:$0x1]   ;;  %v8_v2 = vld [vmem:[#allocation3] sm:$0x1]   ;;  %p44_p3 = por %p43_p2, %p42_p1 }
   0xa   :  { %13 = vrot.lane.b32.xlu0 %v12_v1, %s59_s0  ;;  %10 = vst.msk [vmem:[#allocation2] sm:$0x1] %vm9_vm0, %v8_v2  }
   0xb   :  { %p45_p4 = pnand %p44_p3, %p38_p0 }
  0x7c   :  { %v14_v3 = vpop.permute.xlu0 %13  }
  0x7d   :  { %16 = vst.msk [vmem:[#allocation2] sm:$0x1] %vm15_vm1, %v14_v3  }
  0x84   :  { %v21_v4 = vld [vmem:[#allocation2] sm:$0x1] }
  0x85   :  { %24 = vst [vmem:[#allocation0] sm:$0x1] %v21_v4 }
  0x86   :  { %48 = shalt.err (!%p45_p4)
}
  0x87   :  { %32 = dma.vmem_to_hbm [thread:$0]  %s30_s9, 16, %s78_s1, [#allocation1]  }
  0x88   :  { %57 = dma.done.wait [#allocation1], 16  }
  0x89   :  { %58 = vsyncadd [#allocation1], 4294967280 }
  0x8a   :  { %34 = vsyncpa [#allocation1], 1 }

// kernel: meta_learner_forward.1
= control target key start
LH: loop header
LB: loop body
LE: loop exit
PB: predicated region body
PF: predicated region fallthrough
CT: control target
= control target key end

     0   :  { %s4260_s27 = smov 0   ;;  %s4967_s0 = inlined_call_operand.vmem [shape: f32[8,8,32], index: 0, kind: input, shape index: {}]   ;;  %s4968_s1 = inlined_call_operand.vmem [shape: s32[8,8,1], index: 1, kind: input, shape index: {}]   ;;  %s4969_s2 = inlined_call_operand.vmem [shape: f32[8,32], index: 2, kind: input, shape index: {}]   ;;  %s4970_s3 = inlined_call_operand.vmem [shape: s32[8,1], index: 3, kind: input, shape index: {}]   ;;  %s4971_s4 = inlined_call_operand.vmem [shape: f32[32,128], index: 4, kind: input, shape index: {}]   ;;  %s4972_s5 = inlined_call_operand.vmem [shape: f32[1,128], index: 5, kind: input, shape index: {}]   ;;  %s4973_s6 = inlined_call_operand.vmem [shape: f32[2,4,128], index: 6, kind: output, shape index: {0}]   ;;  %s4974_s7 = inlined_call_operand.vmem [shape: f32[2,32,128], index: 7, kind: output, shape index: {1}]   ;;  %s4975_s8 = inlined_call_operand.vmem [shape: f32[2,1,128], index: 8, kind: output, shape index: {2}]  }
   0x1 LB: > { %s4266_s28 = sadd.s32 4294967295, %s4210_s27   ;;  %p3631_p0 = scmp.ge.s32.totalorder %s4210_s27, 1  ;;  %s4210_s27 = sphi %s4260_s27, %s19_s27  }
   0x2   : > { %p279_p1 = scmp.lt.s32.totalorder %s4210_s27, 3 }
   0x4   : > { %p280_p2 = pnand %p3631_p0, %p279_p1 }
   0x6   : > { %283 = sbr.rel (%p280_p2) target bundleno = 1665 (0x681), region = 44 }
   0xb   : > { %v4273_v0 = vld [vmem:[%s4971_s4 + $0x18] sm:$0xff]  ;;  %v4976_v1 = vmov 0.0   ;;  %v4280_v2 = vld [vmem:[%s4971_s4 + $0x10] sm:$0xff]  ;;  %s3632_s11 = sshll.u32 %s4266_s28, 2  ;;  %v4290_v3 = vld [vmem:[%s4971_s4 + $0x8] sm:$0xff]  ;;  %v4213_v5 = vmov 0   ;;  %v364_v21 = vlaneseq }
   0xc   : > { %3887 = vmatprep.subr.mxu0 %v4976_v1  ;;  %3898 = vmatprep.subr.mxu1 %v4976_v1  ;;  %p326_p3 = scmp.lt.s32.totalorder %s3632_s11, 7  ;;  %v4299_v4 = vld [vmem:[%s4971_s4] sm:$0xff]  ;;  %vm402_vm0 = vcmask 261120   ;;  %vm4214_vm1 = vmmov 0   ;;  %vm735_vm2 = vcmask 64512   ;;  %vm3471_vm8 = vcmask 1041409  }
   0xd   : > { %3888 = vmatpush3.msra.mxu0 %v4273_v0  ;;  %3899 = vmatpush3.msra.mxu1 %v4273_v0  ;;  %v358_v14 = vld [vmem:[%s4970_s3] sm:$0xff]  ;;  %v398_v22 = vshrl.u32 %v364_v21, 7  ;;  %v4395_v29 = vand.u32 127, %v364_v21  ;;  %p337_p4 = scmp.lt.s32.totalorder %s4266_s28, 1  ;;  %vm3473_vm9 = vcmask 1042434   ;;  %vm3475_vm10 = vcmask 1043459  }
   0xe   : > { %3889 = vmatprep.subr.mxu0 %v4976_v1  ;;  %3900 = vmatprep.subr.mxu1 %v4976_v1  ;;  %s4998_s11 = smov (!%p326_p3, %s3632_s11), 7  ;;  %v4391_v27 = vld [vmem:[%s4972_s5] sm:$0x1]  ;;  %vm3478_vm11 = vcmask 1043456  }
   0xf   : > { %3890 = vmatpush3.msra.mxu0 %v4280_v2  ;;  %3901 = vmatpush3.msra.mxu1 %v4280_v2  ;;  %s3633_s16 = sshll.u32 %s4998_s11, 3  ;;  %v4384_v25 = vsub.s32 0, %v398_v22  ;;  %4987 = vst [vmem:[#allocation5_spill] sm:$0xff] %v4395_v29  ;;  %s5000_s28 = smov (!%p337_p4, %s4266_s28), 1 }
  0x10   : > { %3891 = vmatprep.subr.mxu0 %v4976_v1  ;;  %3902 = vmatprep.subr.mxu1 %v4976_v1  ;;  %s4307_s19 = scalar_lea.vmem %s4968_s1, %s3633_s16  ;;  %s4312_s22 = scalar_lea.vmem %s4967_s0, %s3633_s16 }
  0x11   : > { %3892 = vmatpush3.msra.mxu0 %v4290_v3  ;;  %3903 = vmatpush3.msra.mxu1 %v4290_v3  ;;  %v353_v6 = vld [vmem:[%s4307_s19] sm:$0xff]  ;;  %v4321_v8 = vld [vmem:[%s4312_s22 + $0x8] sm:$0xff]  ;;  %v4347_v10 = vld [vmem:[%s4312_s22 + $0x10] sm:$0xff]  ;;  %v400_v31 = vrot.slane %v4391_v27, %v4384_v25  ;;  %s348_s11 = scalar_lea.vmem %s4975_s8, %s5000_s28  ;;  %s3636_s12 = sshll.u32 %s5000_s28, 2 }
  0x12   : > { %4202 = vset.pattern.permute.xlu0 %v4213_v5  ;;  %3893 = vmatprep.subr.mxu0 %v4976_v1  ;;  %v4318_v7 = vld [vmem:[%s4312_s22] sm:$0xff]  ;;  %v354_v9 = vld [vmem:[%s4307_s19 + $0x8] sm:$0xff]  ;;  %v4352_v11 = vld [vmem:[%s4312_s22 + $0x18] sm:$0xff]  ;;  %s340_s15 = scalar_lea.vmem %s4973_s6, %s3636_s12  ;;  %s3726_s16 = sshll.u32 %s5000_s28, 5 }
  0x13   : > { %3904 = vmatprep.subr.mxu1 %v4976_v1  ;;  %3894 = vmatpush3.msra.mxu0 %v4299_v4  ;;  %4984 = vst [vmem:[#allocation2_spill] sm:$0xff] %v4352_v11  ;;  %v355_v12 = vld [vmem:[%s4307_s19 + $0x10] sm:$0xff]  ;;  %v356_v13 = vld [vmem:[%s4307_s19 + $0x18] sm:$0xff]  ;;  %s345_s19 = scalar_lea.vmem %s4974_s7, %s3726_s16 }
  0x14   : > { %3895 = vmatprep.mubr.msk.f32.mxu0 %vm4214_vm1, %v4976_v1  ;;  %3905 = vmatpush3.msra.mxu1 %v4299_v4 }
  0x15   : > { %3906 = vmatprep.mubr.msk.f32.mxu1 %vm4214_vm1, %v4976_v1  ;;  %367 = vperm.xlu0 %4202, %v353_v6  }
  0x16   : > { %3896 = vmatmul.mubr.msk.f32.vlgmr.msra.gmra.mxu0 %vm402_vm0, %v4318_v7  ;;  %3907 = vmatmul.mubr.msk.f32.vlgmr.msra.gmra.mxu1 %vm402_vm0, %v4321_v8 }
  0x17   : > { %3909 = vmatprep.subr.mxu0 %v4976_v1  ;;  %3920 = vmatprep.subr.mxu1 %v4976_v1 }
  0x18   : > { %3910 = vmatpush3.msra.mxu0 %v4273_v0  ;;  %3921 = vmatpush3.msra.mxu1 %v4273_v0 }
  0x19   : > { %3911 = vmatprep.subr.mxu0 %v4976_v1  ;;  %3922 = vmatprep.subr.mxu1 %v4976_v1 }
  0x1a   : > { %370 = vperm.xlu0 %4202, %v354_v9   ;;  %3912 = vmatpush3.msra.mxu0 %v4280_v2 }
  0x1b   : > { %3923 = vmatpush3.msra.mxu1 %v4280_v2  ;;  %3913 = vmatprep.subr.mxu0 %v4976_v1 }
  0x1c   : > { %3924 = vmatprep.subr.mxu1 %v4976_v1  ;;  %3914 = vmatpush3.msra.mxu0 %v4290_v3 }
  0x1d   : > { %3925 = vmatpush3.msra.mxu1 %v4290_v3  ;;  %3915 = vmatprep.subr.mxu0 %v4976_v1 }
  0x1e   : > { %3926 = vmatprep.subr.mxu1 %v4976_v1  ;;  %3916 = vmatpush3.msra.mxu0 %v4299_v4 }
  0x1f   : > { %3917 = vmatprep.mubr.msk.f32.mxu0 %vm4214_vm1, %v4976_v1  ;;  %3927 = vmatpush3.msra.mxu1 %v4299_v4 }
  0x20   : > { %3928 = vmatprep.mubr.msk.f32.mxu1 %vm4214_vm1, %v4976_v1  ;;  %3918 = vmatmul.mubr.msk.f32.vlgmr.msra.gmra.mxu0 %vm402_vm0, %v4347_v10 }
  0x21   : > { %3929 = vmatmul.mubr.msk.f32.vlgmr.msra.gmra.mxu1 %vm402_vm0, %v4352_v11  ;;  %4203 = vset.pattern.permute.xlu1 %v4213_v5 }
  0x22   : > { %373 = vperm.xlu1 %4203, %v355_v12  }
  0x26   : > { %376 = vperm.xlu1 %4203, %v356_v13  }
  0x38   : > { %703 = vxpose.xlu0.b32.start.end [1/1] (short) (narrow) %v4318_v7, 32 }
  0x45   : > { %962 = vxpose.xlu0.b32.start.end [1/1] (short) (narrow) %v4347_v10, 32 }
  0x4f   : > { %833 = vxpose.xlu1.b32.start.end [1/1] (short) (narrow) %v4321_v8, 32 }
  0x5c   : > { %1091 = vxpose.xlu1.b32.start.end [1/1] (short) (narrow) %v4352_v11, 32 }
  0x7a   : > { %391 = vperm.xlu0 %4202, %v358_v14  }
  0x90   : > { %v368_v15 = vpop.permute.xlu0 %367 }
  0x91   : > { %vm378_vm3 = vcmp.eq.s32.totalorder %v4395_v29, %v368_v15 }
  0x92   : > { %v4408_v38 = vsel %vm378_vm3, 1.0, %v4976_v1 }
  0x95   : > { %v371_v16 = vpop.permute.xlu0 %370 }
  0x96   : > { %vm379_vm4 = vcmp.eq.s32.totalorder %v4395_v29, %v371_v16 }
  0x97   : > { %v4411_v39 = vsel %vm379_vm4, 1.0, %v4976_v1 }
  0x9d   : > { %v374_v18 = vpop.permute.xlu1 %373 }
  0x9e   : > { %vm380_vm5 = vcmp.eq.s32.totalorder %v4395_v29, %v374_v18 }
  0x9f   : > { %v4440_v52 = vsel %vm380_vm5, 1.0, %v4976_v1 }
  0xa1   : > { %v377_v20 = vpop.permute.xlu1 %376 }
  0xa2   : > { %vm381_vm6 = vcmp.eq.s32.totalorder %v4395_v29, %v377_v20 }
  0xa3   : > { %v4443_v55 = vsel %vm381_vm6, 1.0, %v4976_v1 }
  0xb4   : > { %v4372_v17 = vpop.trf.xlu0 }
  0xb5   : > { %4985 = vst [vmem:[#allocation3_spill] sm:$0xff] %v4372_v17  ;;  %3933 = vmatprep.mubr.msk.f32.mxu0 %vm735_vm2, %v4372_v17 }
  0xb8   : > { %v4376_v19 = vpop.trf.xlu0 }
  0xbc   : > { %v4380_v24 = vpop.trf.xlu0 }
  0xc0   : > { %v4393_v28 = vpop.trf.xlu0 }
  0xc4   : > { %v4405_v37 = vpop.trf.xlu0 }
  0xc8   : > { %v4425_v47 = vpop.trf.xlu0 }
  0xcb   : > { %v4378_v23 = vpop.trf.xlu1 }
  0xcc   : > { %4986 = vst [vmem:[#allocation4_spill] sm:$0xff] %v4378_v23  ;;  %3941 = vmatprep.mubr.msk.f32.mxu1 %vm735_vm2, %v4378_v23  ;;  %v4455_v59 = vpop.trf.xlu0 }
  0xcf   : > { %v4386_v26 = vpop.trf.xlu1 }
  0xd0   : > { %v4473_v63 = vpop.trf.xlu0 }
  0xd1   : > { %4988 = vst [vmem:[#allocation6_spill] sm:$0xff] %v4473_v63 }
  0xd3   : > { %v4397_v30 = vpop.trf.xlu1 }
  0xd6   : > { %v545_v32 = vpop.f32.mrf.mxu1  ;;  %v472_v33 = vpop.f32.mrf.mxu0 }
  0xd7   : > { %v546_v34 = vadd.f32 %v545_v32, %v400_v31  ;;  %v473_v35 = vadd.f32 %v472_v33, %v400_v31  ;;  %v4403_v36 = vpop.trf.xlu1 }
  0xd8   : > { %v3897_v40 = vpop.f32.mrf.mxu0  ;;  %v3908_v41 = vpop.f32.mrf.mxu1 }
  0xd9   : > { %v696_v42 = vsub.f32 %v546_v34, %v4411_v39  ;;  %v695_v43 = vsub.f32 %v473_v35, %v4408_v38 }
  0xdb   : > { %v4415_v44 = vmul.f32 0.015625, %v696_v42  ;;  %v4417_v45 = vmul.f32 0.015625, %v695_v43  ;;  %v4419_v46 = vpop.trf.xlu1 }
  0xdd   : > { %3931 = vmatprep.subr.mxu0 %v4417_v45  ;;  %3939 = vmatprep.subr.mxu1 %v4415_v44 }
  0xde   : > { %3940 = vmatpush3.msra.mxu1 %v4415_v44  ;;  %3932 = vmatpush3.msra.mxu0 %v4417_v45 }
  0xdf   : > { %3934 = vmatmul.mubr.msk.f32.vlgmr.msra.gmra.mxu0 %vm735_vm2, %v4376_v19  ;;  %3942 = vmatmul.mubr.msk.f32.vlgmr.msra.gmra.mxu1 %vm735_vm2, %v4386_v26  ;;  %v4432_v48 = vpop.trf.xlu1 }
  0xe0   : > { %v618_v49 = vpop.f32.mrf.mxu0  ;;  %3936 = vmatprep.mubr.msk.f32.mxu0 %vm735_vm2, %v4380_v24  ;;  %3944 = vmatprep.mubr.msk.f32.mxu1 %vm735_vm2, %v4397_v30 }
  0xe1   : > { %v691_v50 = vpop.f32.mrf.mxu1  ;;  %v619_v51 = vadd.f32 %v618_v49, %v400_v31 }
  0xe2   : > { %v692_v53 = vadd.f32 %v691_v50, %v400_v31  ;;  %v3919_v54 = vpop.f32.mrf.mxu0 }
  0xe3   : > { %v697_v56 = vsub.f32 %v619_v51, %v4440_v52  ;;  %v3930_v57 = vpop.f32.mrf.mxu1  ;;  %3937 = vmatmul.mubr.msk.f32.gmra.mxu0 %vm735_vm2, %v4393_v28  ;;  %3945 = vmatmul.mubr.msk.f32.gmra.mxu1 %vm735_vm2, %v4403_v36  ;;  %v4459_v61 = vpop.trf.xlu1 }
  0xe4   : > { %v698_v58 = vsub.f32 %v692_v53, %v4443_v55  ;;  %3949 = vmatprep.mubr.msk.f32.mxu0 %vm735_vm2, %v4405_v37  ;;  %3957 = vmatprep.mubr.msk.f32.mxu1 %vm735_vm2, %v4419_v46 }
  0xe5   : > { %v4457_v60 = vmul.f32 0.015625, %v697_v56 }
  0xe6   : > { %v4461_v62 = vmul.f32 0.015625, %v698_v58 }
  0xe7   : > { %3947 = vmatprep.subr.mxu0 %v4457_v60  ;;  %v4477_v5 = vpop.trf.xlu1 }
  0xe8   : > { %3955 = vmatprep.subr.mxu1 %v4461_v62  ;;  %3948 = vmatpush3.msra.mxu0 %v4457_v60  ;;  %4989 = vst [vmem:[#allocation7_spill] sm:$0xff] %v4477_v5 }
  0xe9   : > { %3956 = vmatpush3.msra.mxu1 %v4461_v62  ;;  %3950 = vmatmul.mubr.msk.f32.vlgmr.msra.gmra.mxu0 %vm735_vm2, %v4425_v47 }
  0xea   : > { %3958 = vmatmul.mubr.msk.f32.vlgmr.msra.gmra.mxu1 %vm735_vm2, %v4432_v48  ;;  %3952 = vmatprep.mubr.msk.f32.mxu0 %vm735_vm2, %v4455_v59 }
  0xeb   : > { %3960 = vmatprep.mubr.msk.f32.mxu1 %vm735_vm2, %v4459_v61  ;;  %3963 = vmatprep.subr.mxu0 %v4976_v1 }
  0xec   : > { %3974 = vmatprep.subr.mxu1 %v4976_v1 }
  0xed   : > { %3953 = vmatmul.mubr.msk.f32.gmra.mxu0 %vm735_vm2, %v4473_v63 }
  0xee   : > { %3961 = vmatmul.mubr.msk.f32.gmra.mxu1 %vm735_vm2, %v4477_v5  ;;  %3971 = vmatprep.mubr.msk.f32.mxu0 %vm4214_vm1, %v4976_v1 }
  0xef   : > { %3982 = vmatprep.mubr.msk.f32.mxu1 %vm4214_vm1, %v4976_v1 }
 0x19f   : > { %v3935_v6 = vpop.f32.mrf.mxu0  ;;  %v3943_v9 = vpop.f32.mrf.mxu1 }
 0x1a0   : > { %v1245_v20 = vmul.f32 0.1, %v3935_v6  ;;  %v1249_v21 = vmul.f32 0.1, %v3943_v9 }
 0x1a1   : > { %v814_v12 = vpop.f32.mrf.mxu0  ;;  %v943_v13 = vpop.f32.mrf.mxu1 }
 0x1a2   : > { %v1244_v40 = vmul.f32 0.1, %v814_v12  ;;  %v1248_v41 = vmul.f32 0.1, %v943_v13  ;;  %v4506_v50 = vsub.f32 %v4290_v3, %v1245_v20  ;;  %v4509_v51 = vsub.f32 %v4290_v3, %v1249_v21 }
 0x1a3   : > { %v3938_v14 = vpop.f32.mrf.mxu0  ;;  %v3946_v15 = vpop.f32.mrf.mxu1 }
 0x1a4   : > { %v1247_v16 = vmul.f32 0.1, %v3938_v14  ;;  %v1251_v18 = vmul.f32 0.1, %v3946_v15  ;;  %v4516_v56 = vsub.f32 %v4299_v4, %v1244_v40  ;;  %v4519_v57 = vsub.f32 %v4299_v4, %v1248_v41 }
 0x1a5   : > { %v824_v22 = vpop.f32.mrf.mxu0  ;;  %v953_v31 = vpop.f32.mrf.mxu1 }
 0x1a6   : > { %v4490_v32 = vsub.f32 %v4273_v0, %v1247_v16  ;;  %v4493_v33 = vsub.f32 %v4273_v0, %v1251_v18  ;;  %v1246_v34 = vmul.f32 0.1, %v824_v22  ;;  %v1250_v35 = vmul.f32 0.1, %v953_v31 }
 0x1a8   : > { %v4496_v42 = vsub.f32 %v4280_v2, %v1246_v34  ;;  %v4499_v43 = vsub.f32 %v4280_v2, %v1250_v35  ;;  %3964 = vmatpush3.msra.mxu0 %v4490_v32  ;;  %3975 = vmatpush3.msra.mxu1 %v4493_v33 }
 0x1a9   : > { %v3951_v49 = vpop.f32.mrf.mxu0  ;;  %3965 = vmatprep.subr.mxu0 %v4976_v1  ;;  %3976 = vmatprep.subr.mxu1 %v4976_v1 }
 0x1aa   : > { %v3959_v53 = vpop.f32.mrf.mxu1  ;;  %3966 = vmatpush3.msra.mxu0 %v4496_v42  ;;  %3977 = vmatpush3.msra.mxu1 %v4499_v43  ;;  %v1253_v15 = vmul.f32 0.1, %v3951_v49 }
 0x1ab   : > { %v1072_v54 = vpop.f32.mrf.mxu0  ;;  %3967 = vmatprep.subr.mxu0 %v4976_v1  ;;  %3978 = vmatprep.subr.mxu1 %v4976_v1  ;;  %v1257_v21 = vmul.f32 0.1, %v3959_v53 }
 0x1ac   : > { %v1201_v58 = vpop.f32.mrf.mxu1  ;;  %3968 = vmatpush3.msra.mxu0 %v4506_v50  ;;  %3979 = vmatpush3.msra.mxu1 %v4509_v51  ;;  %v1252_v34 = vmul.f32 0.1, %v1072_v54 }
 0x1ad   : > { %v3954_v6 = vpop.f32.mrf.mxu0  ;;  %3969 = vmatprep.subr.mxu0 %v4976_v1  ;;  %3980 = vmatprep.subr.mxu1 %v4976_v1  ;;  %v1256_v40 = vmul.f32 0.1, %v1201_v58  ;;  %v4558_v49 = vsub.f32 %v4290_v3, %v1257_v21 }
 0x1ae   : > { %v1255_v9 = vmul.f32 0.1, %v3954_v6  ;;  %v3962_v12 = vpop.f32.mrf.mxu1  ;;  %3970 = vmatpush3.msra.mxu0 %v4516_v56  ;;  %3981 = vmatpush3.msra.mxu1 %v4519_v57 }
 0x1af   : > { %v1259_v13 = vmul.f32 0.1, %v3962_v12  ;;  %v1082_v14 = vpop.f32.mrf.mxu0  ;;  %3972 = vmatmul.mubr.msk.f32.vlgmr.msra.gmra.mxu0 %vm402_vm0, %v4318_v7  ;;  %3983 = vmatmul.mubr.msk.f32.vlgmr.msra.gmra.mxu1 %vm402_vm0, %v4321_v8  ;;  %v4568_v53 = vsub.f32 %v4299_v4, %v1256_v40  ;;  %v1232_v12 = vrot.slane %v4457_v60, 4 }
 0x1b0   : > { %v4532_v16 = vsub.f32 %v4273_v0, %v1255_v9  ;;  %v1254_v18 = vmul.f32 0.1, %v1082_v14  ;;  %v1211_v20 = vpop.f32.mrf.mxu1  ;;  %3985 = vmatprep.subr.mxu0 %v4976_v1  ;;  %3996 = vmatprep.subr.mxu1 %v4976_v1 }
 0x1b1   : > { %v4537_v22 = vsub.f32 %v4273_v0, %v1259_v13  ;;  %v1258_v31 = vmul.f32 0.1, %v1211_v20  ;;  %3993 = vmatprep.mubr.msk.f32.mxu0 %vm4214_vm1, %v4976_v1  ;;  %4004 = vmatprep.mubr.msk.f32.mxu1 %vm4214_vm1, %v4976_v1  ;;  %v4553_v0 = vsub.f32 %v4290_v3, %v1253_v15  ;;  %v1226_v3 = vrot.slane %v4415_v44, 4 }
 0x1b2   : > { %v4544_v35 = vsub.f32 %v4280_v2, %v1254_v18  ;;  %3986 = vmatpush3.msra.mxu0 %v4532_v16  ;;  %v1238_v13 = vrot.slane %v4461_v62, 4  ;;  %v1233_v18 = vadd.f32 %v1232_v12, %v4457_v60 }
 0x1b3   : > { %v4548_v41 = vsub.f32 %v4280_v2, %v1258_v31  ;;  %3997 = vmatpush3.msra.mxu1 %v4537_v22  ;;  %3987 = vmatprep.subr.mxu0 %v4976_v1  ;;  %v4563_v2 = vsub.f32 %v4299_v4, %v1252_v34  ;;  %v1220_v4 = vrot.slane %v4417_v45, 4  ;;  %v1227_v58 = vadd.f32 %v1226_v3, %v4415_v44 }
 0x1b4   : > { %3998 = vmatprep.subr.mxu1 %v4976_v1  ;;  %3988 = vmatpush3.msra.mxu0 %v4544_v35  ;;  %v1239_v20 = vadd.f32 %v1238_v13, %v4461_v62  ;;  %v1234_v34 = vrot.slane %v1233_v18, 2 }
 0x1b5   : > { %3999 = vmatpush3.msra.mxu1 %v4548_v41  ;;  %3989 = vmatprep.subr.mxu0 %v4976_v1  ;;  %v1221_v54 = vadd.f32 %v1220_v4, %v4417_v45  ;;  %v1228_v9 = vrot.slane %v1227_v58, 2 }
 0x1b6   : > { %4000 = vmatprep.subr.mxu1 %v4976_v1  ;;  %3990 = vmatpush3.msra.mxu0 %v4553_v0  ;;  %v1240_v40 = vrot.slane %v1239_v20, 2  ;;  %v1235_v4 = vadd.f32 %v1234_v34, %v1233_v18 }
 0x1b7   : > { %4001 = vmatpush3.msra.mxu1 %v4558_v49  ;;  %3991 = vmatprep.subr.mxu0 %v4976_v1  ;;  %v1222_v6 = vrot.slane %v1221_v54, 2  ;;  %v1229_v15 = vadd.f32 %v1228_v9, %v1227_v58 }
 0x1b8   : > { %4002 = vmatprep.subr.mxu1 %v4976_v1  ;;  %3992 = vmatpush3.msra.mxu0 %v4563_v2  ;;  %v1241_v44 = vadd.f32 %v1240_v40, %v1239_v20 }
 0x1b9   : > { %4003 = vmatpush3.msra.mxu1 %v4568_v53  ;;  %3994 = vmatmul.mubr.msk.f32.vlgmr.msra.gmra.mxu0 %vm402_vm0, %v4347_v10  ;;  %v1223_v14 = vadd.f32 %v1222_v6, %v1221_v54  ;;  %v1230_v31 = vrot.slane %v1229_v15, 1 }
 0x1ba   : > { %4005 = vmatmul.mubr.msk.f32.vlgmr.msra.gmra.mxu1 %vm402_vm0, %v4352_v11  ;;  %4009 = vmatprep.mubr.msk.f32.mxu0 %vm735_vm2, %v4372_v17  ;;  %v1242_v17 = vrot.slane %v1241_v44, 1 }
 0x1bb   : > { %4017 = vmatprep.mubr.msk.f32.mxu1 %vm735_vm2, %v4378_v23  ;;  %v1224_v21 = vrot.slane %v1223_v14, 1  ;;  %v1231_v45 = vadd.f32 %v1230_v31, %v1229_v15  ;;  %v1236_v23 = vrot.slane %v1235_v4, 1 }
 0x1bc   : > { %v1243_v62 = vadd.f32 %v1242_v17, %v1241_v44 }
 0x1bd   : > { %v1225_v1 = vadd.f32 %v1224_v21, %v1223_v14  ;;  %v1277_v29 = vmul.f32 0.1, %v1231_v45  ;;  %v1237_v60 = vadd.f32 %v1236_v23, %v1235_v4 }
 0x1be   : > { %v1279_v20 = vmul.f32 0.1, %v1243_v62 }
 0x1bf   : > { %v1276_v3 = vmul.f32 0.1, %v1225_v1  ;;  %v4595_v54 = vsub.f32 %v4391_v27, %v1277_v29  ;;  %v1278_v14 = vmul.f32 0.1, %v1237_v60 }
 0x1c0   : > { %v4611_v34 = vsub.f32 %v4391_v27, %v1279_v20 }
 0x1c1   : > { %v4592_v11 = vsub.f32 %v4391_v27, %v1276_v3  ;;  %v1295_v6 = vrot.slane %v4595_v54, %v4384_v25  ;;  %v4608_v31 = vsub.f32 %v4391_v27, %v1278_v14 }
 0x1c2   : > { %v1303_v27 = vrot.slane %v4611_v34, %v4384_v25 }
 0x1c3   : > { %v1291_v58 = vrot.slane %v4592_v11, %v4384_v25  ;;  %v1299_v40 = vrot.slane %v4608_v31, %v4384_v25 }
 0x26f   : > { %v1374_v9 = vpop.f32.mrf.mxu0  ;;  %v1444_v12 = vpop.f32.mrf.mxu1 }
 0x270   : > { %v1375_v1 = vadd.f32 %v1374_v9, %v1291_v58  ;;  %v1445_v13 = vadd.f32 %v1444_v12, %v1295_v6 }
 0x271   : > { %v3973_v15 = vpop.f32.mrf.mxu0  ;;  %v3984_v18 = vpop.f32.mrf.mxu1 }
 0x272   : > { %v1588_v21 = vsub.f32 %v1375_v1, %v4408_v38  ;;  %v1589_v29 = vsub.f32 %v1445_v13, %v4411_v39  ;;  %v4990_v1 = vmov 0.0  }
 0x274   : > { %v4603_v23 = vmul.f32 0.015625, %v1588_v21  ;;  %v4605_v17 = vmul.f32 0.015625, %v1589_v29 }
 0x276   : > { %4007 = vmatprep.subr.mxu0 %v4603_v23  ;;  %4015 = vmatprep.subr.mxu1 %v4605_v17 }
 0x277   : > { %4008 = vmatpush3.msra.mxu0 %v4603_v23  ;;  %4016 = vmatpush3.msra.mxu1 %v4605_v17 }
 0x278   : > { %4010 = vmatmul.mubr.msk.f32.vlgmr.msra.gmra.mxu0 %vm735_vm2, %v4376_v19  ;;  %4018 = vmatmul.mubr.msk.f32.vlgmr.msra.gmra.mxu1 %vm735_vm2, %v4386_v26 }
 0x279   : > { %v1514_v45 = vpop.f32.mrf.mxu0  ;;  %4012 = vmatprep.mubr.msk.f32.mxu0 %vm735_vm2, %v4380_v24  ;;  %4020 = vmatprep.mubr.msk.f32.mxu1 %vm735_vm2, %v4397_v30 }
 0x27a   : > { %v1515_v4 = vadd.f32 %v1514_v45, %v1299_v40  ;;  %v1584_v44 = vpop.f32.mrf.mxu1 }
 0x27b   : > { %v1585_v3 = vadd.f32 %v1584_v44, %v1303_v27  ;;  %v3995_v60 = vpop.f32.mrf.mxu0 }
 0x27c   : > { %v1590_v62 = vsub.f32 %v1515_v4, %v4440_v52  ;;  %v4006_v58 = vpop.f32.mrf.mxu1  ;;  %4013 = vmatmul.mubr.msk.f32.gmra.mxu0 %vm735_vm2, %v4393_v28  ;;  %4021 = vmatmul.mubr.msk.f32.gmra.mxu1 %vm735_vm2, %v4403_v36 }
 0x27d   : > { %v1591_v6 = vsub.f32 %v1585_v3, %v4443_v55  ;;  %4025 = vmatprep.mubr.msk.f32.mxu0 %vm735_vm2, %v4405_v37  ;;  %4033 = vmatprep.mubr.msk.f32.mxu1 %vm735_vm2, %v4419_v46 }
 0x27e   : > { %v4639_v9 = vmul.f32 0.015625, %v1590_v62 }
 0x27f   : > { %v4641_v12 = vmul.f32 0.015625, %v1591_v6 }
 0x280   : > { %4023 = vmatprep.subr.mxu0 %v4639_v9 }
 0x281   : > { %4031 = vmatprep.subr.mxu1 %v4641_v12  ;;  %4024 = vmatpush3.msra.mxu0 %v4639_v9 }
 0x282   : > { %4032 = vmatpush3.msra.mxu1 %v4641_v12  ;;  %4026 = vmatmul.mubr.msk.f32.vlgmr.msra.gmra.mxu0 %vm735_vm2, %v4425_v47 }
 0x283   : > { %4034 = vmatmul.mubr.msk.f32.vlgmr.msra.gmra.mxu1 %vm735_vm2, %v4432_v48  ;;  %4028 = vmatprep.mubr.msk.f32.mxu0 %vm735_vm2, %v4455_v59 }
 0x284   : > { %4036 = vmatprep.mubr.msk.f32.mxu1 %vm735_vm2, %v4459_v61  ;;  %4039 = vmatprep.subr.mxu0 %v4990_v1 }
 0x285   : > { %4050 = vmatprep.subr.mxu1 %v4990_v1 }
 0x286   : > { %4029 = vmatmul.mubr.msk.f32.gmra.mxu0 %vm735_vm2, %v4473_v63 }
 0x287   : > { %4037 = vmatmul.mubr.msk.f32.gmra.mxu1 %vm735_vm2, %v4477_v5  ;;  %4047 = vmatprep.mubr.msk.f32.mxu0 %vm4214_vm1, %v4990_v1 }
 0x288   : > { %4058 = vmatprep.mubr.msk.f32.mxu1 %vm4214_vm1, %v4990_v1 }
 0x338   : > { %v4011_v13 = vpop.f32.mrf.mxu0  ;;  %v4019_v14 = vpop.f32.mrf.mxu1 }
 0x339   : > { %v1961_v45 = vmul.f32 0.1, %v4011_v13  ;;  %v1965_v27 = vmul.f32 0.1, %v4019_v14 }
 0x33a   : > { %v1662_v15 = vpop.f32.mrf.mxu0  ;;  %v1747_v18 = vpop.f32.mrf.mxu1 }
 0x33b   : > { %v1960_v6 = vmul.f32 0.1, %v1662_v15  ;;  %v1964_v5 = vmul.f32 0.1, %v1747_v18 }
 0x33c   : > { %v4014_v20 = vpop.f32.mrf.mxu0  ;;  %v4022_v21 = vpop.f32.mrf.mxu1 }
 0x33d   : > { %v1963_v29 = vmul.f32 0.1, %v4014_v20  ;;  %v1967_v40 = vmul.f32 0.1, %v4022_v21  ;;  %v4692_v14 = vsub.f32 %v4516_v56, %v1960_v6  ;;  %v4695_v15 = vsub.f32 %v4519_v57, %v1964_v5 }
 0x33e   : > { %v1672_v4 = vpop.f32.mrf.mxu0  ;;  %v1757_v44 = vpop.f32.mrf.mxu1  ;;  %v1942_v6 = vrot.slane %v4605_v17, 4 }
 0x33f   : > { %v4666_v3 = vsub.f32 %v4490_v32, %v1963_v29  ;;  %v4669_v60 = vsub.f32 %v4493_v33, %v1967_v40  ;;  %v1962_v62 = vmul.f32 0.1, %v1672_v4  ;;  %v1966_v58 = vmul.f32 0.1, %v1757_v44 }
 0x340   : > { %v4682_v32 = vsub.f32 %v4506_v50, %v1961_v45  ;;  %v4685_v33 = vsub.f32 %v4509_v51, %v1965_v27 }
 0x341   : > { %v4672_v63 = vsub.f32 %v4496_v42, %v1962_v62  ;;  %v4675_v20 = vsub.f32 %v4499_v43, %v1966_v58  ;;  %4040 = vmatpush3.msra.mxu0 %v4666_v3  ;;  %4051 = vmatpush3.msra.mxu1 %v4669_v60  ;;  %v1936_v58 = vrot.slane %v4603_v23, 4 }
 0x342   : > { %v4027_v13 = vpop.f32.mrf.mxu0  ;;  %4041 = vmatprep.subr.mxu0 %v4990_v1  ;;  %4052 = vmatprep.subr.mxu1 %v4990_v1 }
 0x343   : > { %v4035_v42 = vpop.f32.mrf.mxu1  ;;  %4042 = vmatpush3.msra.mxu0 %v4672_v63  ;;  %4053 = vmatpush3.msra.mxu1 %v4675_v20  ;;  %v1969_v5 = vmul.f32 0.1, %v4027_v13  ;;  %v1937_v13 = vadd.f32 %v1936_v58, %v4603_v23 }
 0x344   : > { %v1832_v43 = vpop.f32.mrf.mxu0  ;;  %4043 = vmatprep.subr.mxu0 %v4990_v1  ;;  %4054 = vmatprep.subr.mxu1 %v4990_v1  ;;  %v1973_v27 = vmul.f32 0.1, %v4035_v42  ;;  %v1943_v42 = vadd.f32 %v1942_v6, %v4605_v17 }
 0x345   : > { %v1917_v50 = vpop.f32.mrf.mxu1  ;;  %4044 = vmatpush3.msra.mxu0 %v4682_v32  ;;  %4055 = vmatpush3.msra.mxu1 %v4685_v33 }
 0x346   : > { %v4030_v51 = vpop.f32.mrf.mxu0  ;;  %4045 = vmatprep.subr.mxu0 %v4990_v1  ;;  %4056 = vmatprep.subr.mxu1 %v4990_v1 }
 0x347   : > { %v1971_v18 = vmul.f32 0.1, %v4030_v51  ;;  %v4038_v21 = vpop.f32.mrf.mxu1  ;;  %4046 = vmatpush3.msra.mxu0 %v4692_v14  ;;  %4057 = vmatpush3.msra.mxu1 %v4695_v15  ;;  %v1954_v51 = vrot.slane %v4641_v12, 4 }
 0x348   : > { %v1975_v56 = vmul.f32 0.1, %v4038_v21  ;;  %v1842_v29 = vpop.f32.mrf.mxu0  ;;  %4048 = vmatmul.mubr.msk.f32.vlgmr.msra.gmra.mxu0 %vm402_vm0, %v4318_v7  ;;  %4059 = vmatmul.mubr.msk.f32.vlgmr.msra.gmra.mxu1 %vm402_vm0, %v4321_v8  ;;  %v1968_v7 = vmul.f32 0.1, %v1832_v43  ;;  %v1938_v43 = vrot.slane %v1937_v13, 2 }
 0x349   : > { %v4708_v57 = vsub.f32 %v4532_v16, %v1971_v18  ;;  %v1970_v40 = vmul.f32 0.1, %v1842_v29  ;;  %v1927_v45 = vpop.f32.mrf.mxu1  ;;  %4061 = vmatprep.subr.mxu0 %v4990_v1  ;;  %4072 = vmatprep.subr.mxu1 %v4990_v1  ;;  %v1972_v16 = vmul.f32 0.1, %v1917_v50  ;;  %v1944_v50 = vrot.slane %v1943_v42, 2 }
 0x34a   : > { %v4713_v4 = vsub.f32 %v4537_v22, %v1975_v56  ;;  %v1974_v44 = vmul.f32 0.1, %v1927_v45  ;;  %4069 = vmatprep.mubr.msk.f32.mxu0 %vm4214_vm1, %v4990_v1  ;;  %4080 = vmatprep.mubr.msk.f32.mxu1 %vm4214_vm1, %v4990_v1  ;;  %v4729_v22 = vsub.f32 %v4553_v0, %v1969_v5  ;;  %v1939_v18 = vadd.f32 %v1938_v43, %v1937_v13 }
 0x34b   : > { %v4720_v8 = vsub.f32 %v4544_v35, %v1970_v40  ;;  %4062 = vmatpush3.msra.mxu0 %v4708_v57  ;;  %v4734_v35 = vsub.f32 %v4558_v49, %v1973_v27  ;;  %v4744_v0 = vsub.f32 %v4568_v53, %v1972_v16  ;;  %v4991_v49 = vld [vmem:[#allocation2_spill] sm:$0xff]  ;;  %v4993_v53 = vld [vmem:[#allocation4_spill] sm:$0xff]  ;;  %v1945_v21 = vadd.f32 %v1944_v50, %v1943_v42 }
 0x34c   : > { %v4724_v62 = vsub.f32 %v4548_v41, %v1974_v44  ;;  %4073 = vmatpush3.msra.mxu1 %v4713_v4  ;;  %4063 = vmatprep.subr.mxu0 %v4990_v1  ;;  %v4739_v41 = vsub.f32 %v4563_v2, %v1968_v7  ;;  %v4992_v2 = vld [vmem:[#allocation3_spill] sm:$0xff]  ;;  %v1955_v29 = vadd.f32 %v1954_v51, %v4641_v12  ;;  %v1940_v5 = vrot.slane %v1939_v18, 1 }
 0x34d   : > { %4074 = vmatprep.subr.mxu1 %v4990_v1  ;;  %4064 = vmatpush3.msra.mxu0 %v4720_v8  ;;  %v1946_v40 = vrot.slane %v1945_v21, 1 }
 0x34e   : > { %4075 = vmatpush3.msra.mxu1 %v4724_v62  ;;  %4065 = vmatprep.subr.mxu0 %v4990_v1  ;;  %v1956_v27 = vrot.slane %v1955_v29, 2  ;;  %v1941_v44 = vadd.f32 %v1940_v5, %v1939_v18 }
 0x34f   : > { %4076 = vmatprep.subr.mxu1 %v4990_v1  ;;  %4066 = vmatpush3.msra.mxu0 %v4729_v22  ;;  %v1947_v23 = vadd.f32 %v1946_v40, %v1945_v21 }
 0x350   : > { %4077 = vmatpush3.msra.mxu1 %v4734_v35  ;;  %4067 = vmatprep.subr.mxu0 %v4990_v1  ;;  %v1957_v17 = vadd.f32 %v1956_v27, %v1955_v29  ;;  %v1992_v16 = vmul.f32 0.1, %v1941_v44 }
 0x351   : > { %4078 = vmatprep.subr.mxu1 %v4990_v1  ;;  %4068 = vmatpush3.msra.mxu0 %v4739_v41 }
 0x352   : > { %4079 = vmatpush3.msra.mxu1 %v4744_v0  ;;  %4070 = vmatmul.mubr.msk.f32.vlgmr.msra.gmra.mxu0 %vm402_vm0, %v4347_v10  ;;  %v1948_v10 = vrot.slane %v4639_v9, 4  ;;  %v4768_v58 = vsub.f32 %v4592_v11, %v1992_v16 }
 0x353   : > { %4081 = vmatmul.mubr.msk.f32.vlgmr.msra.gmra.mxu1 %vm402_vm0, %v4991_v49  ;;  %4085 = vmatprep.mubr.msk.f32.mxu0 %vm735_vm2, %v4992_v2  ;;  %v1993_v49 = vmul.f32 0.1, %v1947_v23 }
 0x354   : > { %4093 = vmatprep.mubr.msk.f32.mxu1 %vm735_vm2, %v4993_v53  ;;  %v1949_v56 = vadd.f32 %v1948_v10, %v4639_v9  ;;  %v1958_v53 = vrot.slane %v1957_v17, 1  ;;  %v2007_v13 = vrot.slane %v4768_v58, %v4384_v25 }
 0x355   : > { %v4771_v6 = vsub.f32 %v4595_v54, %v1993_v49 }
 0x356   : > { %v1950_v45 = vrot.slane %v1949_v56, 2  ;;  %v1959_v12 = vadd.f32 %v1958_v53, %v1957_v17 }
 0x357   : > { %v2011_v42 = vrot.slane %v4771_v6, %v4384_v25 }
 0x358   : > { %v1951_v7 = vadd.f32 %v1950_v45, %v1949_v56  ;;  %v1995_v11 = vmul.f32 0.1, %v1959_v12 }
 0x35a   : > { %v1952_v2 = vrot.slane %v1951_v7, 1  ;;  %v4787_v27 = vsub.f32 %v4611_v34, %v1995_v11 }
 0x35c   : > { %v1953_v9 = vadd.f32 %v1952_v2, %v1951_v7 }
 0x35e   : > { %v1994_v18 = vmul.f32 0.1, %v1953_v9 }
 0x360   : > { %v4784_v45 = vsub.f32 %v4608_v31, %v1994_v18  ;;  %v2019_v31 = vrot.slane %v4787_v27, %v4384_v25 }
 0x408   : > { %v2090_v43 = vpop.f32.mrf.mxu0  ;;  %v2160_v50 = vpop.f32.mrf.mxu1 }
 0x409   : > { %v2091_v10 = vadd.f32 %v2090_v43, %v2007_v13  ;;  %v2161_v51 = vadd.f32 %v2160_v50, %v2011_v42 }
 0x40a   : > { %v4049_v21 = vpop.f32.mrf.mxu0  ;;  %v4060_v56 = vpop.f32.mrf.mxu1 }
 0x40b   : > { %v2304_v29 = vsub.f32 %v2091_v10, %v4408_v38  ;;  %v2305_v54 = vsub.f32 %v2161_v51, %v4411_v39  ;;  %v2015_v38 = vrot.slane %v4784_v45, %v4384_v25 }
 0x40d   : > { %v4779_v5 = vmul.f32 0.015625, %v2304_v29  ;;  %v4781_v40 = vmul.f32 0.015625, %v2305_v54 }
 0x40f   : > { %4083 = vmatprep.subr.mxu0 %v4779_v5  ;;  %4091 = vmatprep.subr.mxu1 %v4781_v40 }
 0x410   : > { %4084 = vmatpush3.msra.mxu0 %v4779_v5  ;;  %4092 = vmatpush3.msra.mxu1 %v4781_v40 }
 0x411   : > { %4086 = vmatmul.mubr.msk.f32.vlgmr.msra.gmra.mxu0 %vm735_vm2, %v4376_v19  ;;  %4094 = vmatmul.mubr.msk.f32.vlgmr.msra.gmra.mxu1 %vm735_vm2, %v4386_v26 }
 0x412   : > { %v2230_v39 = vpop.f32.mrf.mxu0  ;;  %4088 = vmatprep.mubr.msk.f32.mxu0 %vm735_vm2, %v4380_v24  ;;  %4096 = vmatprep.mubr.msk.f32.mxu1 %vm735_vm2, %v4397_v30 }
 0x413   : > { %v2231_v34 = vadd.f32 %v2230_v39, %v2015_v38  ;;  %v2300_v44 = vpop.f32.mrf.mxu1 }
 0x414   : > { %v2301_v23 = vadd.f32 %v2300_v44, %v2019_v31  ;;  %v4071_v7 = vpop.f32.mrf.mxu0 }
 0x415   : > { %v2306_v17 = vsub.f32 %v2231_v34, %v4440_v52  ;;  %v4082_v19 = vpop.f32.mrf.mxu1  ;;  %4089 = vmatmul.mubr.msk.f32.gmra.mxu0 %vm735_vm2, %v4393_v28  ;;  %4097 = vmatmul.mubr.msk.f32.gmra.mxu1 %vm735_vm2, %v4403_v36  ;;  %v4994_v28 = vld [vmem:[#allocation6_spill] sm:$0xff]  ;;  %v4995_v36 = vld [vmem:[#allocation7_spill] sm:$0xff] }
 0x416   : > { %v2307_v26 = vsub.f32 %v2301_v23, %v4443_v55  ;;  %4101 = vmatprep.mubr.msk.f32.mxu0 %vm735_vm2, %v4405_v37  ;;  %4109 = vmatprep.mubr.msk.f32.mxu1 %vm735_vm2, %v4419_v46  ;;  %v4844_v37 = vld [vmem:[%s4969_s2] sm:$0xff] }
 0x417   : > { %v4815_v24 = vmul.f32 0.015625, %v2306_v17  ;;  %3031 = vxpose.xlu1.b32.start.end [1/1] (short) (narrow) %v4844_v37, 32 }
 0x418   : > { %v4817_v30 = vmul.f32 0.015625, %v2307_v26 }
 0x419   : > { %4099 = vmatprep.subr.mxu0 %v4815_v24 }
 0x41a   : > { %4107 = vmatprep.subr.mxu1 %v4817_v30  ;;  %4100 = vmatpush3.msra.mxu0 %v4815_v24 }
 0x41b   : > { %4108 = vmatpush3.msra.mxu1 %v4817_v30  ;;  %4102 = vmatmul.mubr.msk.f32.vlgmr.msra.gmra.mxu0 %vm735_vm2, %v4425_v47 }
 0x41c   : > { %4110 = vmatmul.mubr.msk.f32.vlgmr.msra.gmra.mxu1 %vm735_vm2, %v4432_v48  ;;  %4104 = vmatprep.mubr.msk.f32.mxu0 %vm735_vm2, %v4455_v59 }
 0x41d   : > { %4112 = vmatprep.mubr.msk.f32.mxu1 %vm735_vm2, %v4459_v61  ;;  %4115 = vmatprep.subr.mxu0 %v4990_v1 }
 0x41e   : > { %4126 = vmatprep.subr.mxu1 %v4990_v1 }
 0x41f   : > { %4105 = vmatmul.mubr.msk.f32.gmra.mxu0 %vm735_vm2, %v4994_v28 }
 0x420   : > { %4113 = vmatmul.mubr.msk.f32.gmra.mxu1 %vm735_vm2, %v4995_v36  ;;  %4123 = vmatprep.mubr.msk.f32.mxu0 %vm4214_vm1, %v4990_v1 }
 0x421   : > { %4134 = vmatprep.mubr.msk.f32.mxu1 %vm4214_vm1, %v4990_v1 }
 0x4d1   : > { %v4087_v46 = vpop.f32.mrf.mxu0  ;;  %v4095_v47 = vpop.f32.mrf.mxu1 }
 0x4d2   : > { %v2677_v49 = vmul.f32 0.1, %v4087_v46  ;;  %v2681_v2 = vmul.f32 0.1, %v4095_v47 }
 0x4d3   : > { %v2378_v48 = vpop.f32.mrf.mxu0  ;;  %v2463_v52 = vpop.f32.mrf.mxu1 }
 0x4d4   : > { %v2676_v50 = vmul.f32 0.1, %v2378_v48  ;;  %v2680_v10 = vmul.f32 0.1, %v2463_v52  ;;  %v2693_v56 = vsub.f32 %v4682_v32, %v2677_v49  ;;  %v2664_v48 = vrot.slane %v4815_v24, 4 }
 0x4d5   : > { %v4090_v55 = vpop.f32.mrf.mxu0  ;;  %v4098_v59 = vpop.f32.mrf.mxu1 }
 0x4d6   : > { %v2679_v61 = vmul.f32 0.1, %v4090_v55  ;;  %v2683_v16 = vmul.f32 0.1, %v4098_v59  ;;  %v2665_v59 = vadd.f32 %v2664_v48, %v4815_v24 }
 0x4d7   : > { %v2388_v53 = vpop.f32.mrf.mxu0  ;;  %v2473_v9 = vpop.f32.mrf.mxu1 }
 0x4d8   : > { %v2695_v12 = vsub.f32 %v4666_v3, %v2679_v61  ;;  %v2699_v13 = vsub.f32 %v4669_v60, %v2683_v16  ;;  %v2678_v42 = vmul.f32 0.1, %v2388_v53  ;;  %v2682_v43 = vmul.f32 0.1, %v2473_v9 }
 0x4d9   : > { %v2697_v3 = vsub.f32 %v4685_v33, %v2681_v2  ;;  %v2666_v2 = vrot.slane %v2665_v59, 2 }
 0x4da   : > { %v2694_v51 = vsub.f32 %v4672_v63, %v2678_v42  ;;  %v2698_v18 = vsub.f32 %v4675_v20, %v2682_v43  ;;  %4116 = vmatpush3.msra.mxu0 %v2695_v12  ;;  %4127 = vmatpush3.msra.mxu1 %v2699_v13  ;;  %v2692_v63 = vsub.f32 %v4692_v14, %v2676_v50 }
 0x4db   : > { %v4103_v21 = vpop.f32.mrf.mxu0  ;;  %4117 = vmatprep.subr.mxu0 %v4990_v1  ;;  %4128 = vmatprep.subr.mxu1 %v4990_v1  ;;  %v2696_v20 = vsub.f32 %v4695_v15, %v2680_v10  ;;  %v2667_v12 = vadd.f32 %v2666_v2, %v2665_v59 }
 0x4dc   : > { %v4111_v60 = vpop.f32.mrf.mxu1  ;;  %4118 = vmatpush3.msra.mxu0 %v2694_v51  ;;  %4129 = vmatpush3.msra.mxu1 %v2698_v18  ;;  %v2685_v14 = vmul.f32 0.1, %v4103_v21  ;;  %v392_v18 = vpop.permute.xlu0 %391 }
 0x4dd   : > { %v2548_v11 = vpop.f32.mrf.mxu0  ;;  %4119 = vmatprep.subr.mxu0 %v4990_v1  ;;  %4130 = vmatprep.subr.mxu1 %v4990_v1  ;;  %v2689_v44 = vmul.f32 0.1, %v4111_v60  ;;  %v2668_v43 = vrot.slane %v2667_v12, 1 }
 0x4de   : > { %v2633_v29 = vpop.f32.mrf.mxu1  ;;  %4120 = vmatpush3.msra.mxu0 %v2693_v56  ;;  %4131 = vmatpush3.msra.mxu1 %v2697_v3  ;;  %v2684_v17 = vmul.f32 0.1, %v2548_v11  ;;  %v2701_v28 = vsub.f32 %v4729_v22, %v2685_v14  ;;  %v2652_v22 = vrot.slane %v4779_v5, 4  ;;  %v4996_v56 = vld [vmem:[#allocation5_spill] sm:$0xff] }
 0x4df   : > { %v4106_v54 = vpop.f32.mrf.mxu0  ;;  %4121 = vmatprep.subr.mxu0 %v4990_v1  ;;  %4132 = vmatprep.subr.mxu1 %v4990_v1  ;;  %vm393_vm7 = vcmp.eq.s32.totalorder %v4996_v56, %v392_v18 }
 0x4e0   : > { %v2687_v32 = vmul.f32 0.1, %v4106_v54  ;;  %v4114_v33 = vpop.f32.mrf.mxu1  ;;  %4122 = vmatpush3.msra.mxu0 %v2692_v63  ;;  %4133 = vmatpush3.msra.mxu1 %v2696_v20  ;;  %v2700_v36 = vsub.f32 %v4739_v41, %v2684_v17  ;;  %v2653_v41 = vadd.f32 %v2652_v22, %v4779_v5  ;;  %v3643_v54 = vsel %vm393_vm7, 1.0, %v4990_v1 }
 0x4e1   : > { %v2691_v38 = vmul.f32 0.1, %v4114_v33  ;;  %v2558_v39 = vpop.f32.mrf.mxu0  ;;  %4124 = vmatmul.mubr.msk.f32.vlgmr.msra.gmra.mxu0 %vm402_vm0, %v4844_v37  ;;  %4135 = vmatmul.mubr.msk.f32.vlgmr.msra.gmra.mxu1 %vm402_vm0, %v4844_v37 }
 0x4e2   : > { %v2703_v15 = vsub.f32 %v4708_v57, %v2687_v32  ;;  %v2686_v31 = vmul.f32 0.1, %v2558_v39  ;;  %v2643_v34 = vpop.f32.mrf.mxu1  ;;  %4137 = vmatprep.subr.mxu0 %v4990_v1  ;;  %4148 = vmatprep.subr.mxu1 %v4990_v1  ;;  %v2688_v57 = vmul.f32 0.1, %v2633_v29  ;;  %v2654_v46 = vrot.slane %v2653_v41, 2 }
 0x4e3   : > { %v2707_v23 = vsub.f32 %v4713_v4, %v2691_v38  ;;  %v2690_v7 = vmul.f32 0.1, %v2643_v34  ;;  %4145 = vmatprep.mubr.msk.f32.mxu0 %vm4214_vm1, %v4990_v1  ;;  %4156 = vmatprep.mubr.msk.f32.mxu1 %vm4214_vm1, %v4990_v1  ;;  %v2705_v4 = vsub.f32 %v4734_v35, %v2689_v44  ;;  %v2658_v35 = vrot.slane %v4781_v40, 4 }
 0x4e4   : > { %v2702_v19 = vsub.f32 %v4720_v8, %v2686_v31  ;;  %4138 = vmatpush3.msra.mxu0 %v2703_v15  ;;  %v2704_v8 = vsub.f32 %v4744_v0, %v2688_v57  ;;  %v2655_v52 = vadd.f32 %v2654_v46, %v2653_v41 }
 0x4e5   : > { %v2706_v26 = vsub.f32 %v4724_v62, %v2690_v7  ;;  %4149 = vmatpush3.msra.mxu1 %v2707_v23  ;;  %4139 = vmatprep.subr.mxu0 %v4990_v1  ;;  %v4884_v62 = vpop.trf.xlu1  ;;  %v2659_v0 = vadd.f32 %v2658_v35, %v4781_v40 }
 0x4e6   : > { %4150 = vmatprep.subr.mxu1 %v4990_v1  ;;  %4140 = vmatpush3.msra.mxu0 %v2702_v19  ;;  %v2656_v16 = vrot.slane %v2655_v52, 1 }
 0x4e7   : > { %4151 = vmatpush3.msra.mxu1 %v2706_v26  ;;  %4141 = vmatprep.subr.mxu0 %v4990_v1  ;;  %v2660_v47 = vrot.slane %v2659_v0, 2 }
 0x4e8   : > { %4152 = vmatprep.subr.mxu1 %v4990_v1  ;;  %4142 = vmatpush3.msra.mxu0 %v2701_v28  ;;  %v2657_v9 = vadd.f32 %v2656_v16, %v2655_v52 }
 0x4e9   : > { %4153 = vmatpush3.msra.mxu1 %v2705_v4  ;;  %4143 = vmatprep.subr.mxu0 %v4990_v1  ;;  %v2661_v55 = vadd.f32 %v2660_v47, %v2659_v0  ;;  %v4905_v24 = vpop.trf.xlu1 }
 0x4ea   : > { %4154 = vmatprep.subr.mxu1 %v4990_v1  ;;  %4144 = vmatpush3.msra.mxu0 %v2700_v36  ;;  %v2708_v13 = vmul.f32 0.1, %v2657_v9 }
 0x4eb   : > { %4155 = vmatpush3.msra.mxu1 %v2704_v8  ;;  %4146 = vmatmul.mubr.msk.f32.vlgmr.msra.gmra.mxu0 %vm402_vm0, %v4844_v37  ;;  %v2662_v49 = vrot.slane %v2661_v55, 1 }
 0x4ec   : > { %4157 = vmatmul.mubr.msk.f32.vlgmr.msra.gmra.mxu1 %vm402_vm0, %v4844_v37  ;;  %4161 = vmatprep.mubr.msk.f32.mxu0 %vm735_vm2, %v4884_v62  ;;  %v2670_v37 = vrot.slane %v4817_v30, 4  ;;  %v2712_v10 = vsub.f32 %v4768_v58, %v2708_v13 }
 0x4ed   : > { %4169 = vmatprep.mubr.msk.f32.mxu1 %vm735_vm2, %v4884_v62  ;;  %v2663_v5 = vadd.f32 %v2662_v49, %v2661_v55  ;;  %v4911_v14 = vpop.trf.xlu1 }
 0x4ee   : > { %v2671_v61 = vadd.f32 %v2670_v37, %v4817_v30  ;;  %v2669_v30 = vadd.f32 %v2668_v43, %v2667_v12  ;;  %v2723_v3 = vrot.slane %v2712_v10, %v4384_v25 }
 0x4ef   : > { %v2709_v42 = vmul.f32 0.1, %v2663_v5 }
 0x4f0   : > { %v2672_v53 = vrot.slane %v2671_v61, 2 }
 0x4f1   : > { %v2713_v51 = vsub.f32 %v4771_v6, %v2709_v42  ;;  %v2710_v6 = vmul.f32 0.1, %v2669_v30  ;;  %v4921_v22 = vpop.trf.xlu1 }
 0x4f2   : > { %v2673_v40 = vadd.f32 %v2672_v53, %v2671_v61 }
 0x4f3   : > { %v2727_v60 = vrot.slane %v2713_v51, %v4384_v25  ;;  %v2714_v23 = vsub.f32 %v4784_v45, %v2710_v6 }
 0x4f4   : > { %v2674_v50 = vrot.slane %v2673_v40, 1 }
 0x4f5   : > { %v2731_v8 = vrot.slane %v2714_v23, %v4384_v25 }
 0x4f6   : > { %v2675_v21 = vadd.f32 %v2674_v50, %v2673_v40 }
 0x4f8   : > { %v2711_v33 = vmul.f32 0.1, %v2675_v21 }
 0x4fa   : > { %v2715_v7 = vsub.f32 %v4787_v27, %v2711_v33 }
 0x4fc   : > { %v2735_v27 = vrot.slane %v2715_v7, %v4384_v25 }
 0x5a1   : > { %v2809_v11 = vpop.f32.mrf.mxu0  ;;  %v2879_v63 = vpop.f32.mrf.mxu1 }
 0x5a2   : > { %v2810_v20 = vadd.f32 %v2809_v11, %v2723_v3  ;;  %v2880_v29 = vadd.f32 %v2879_v63, %v2727_v60 }
 0x5a3   : > { %v4125_v58 = vpop.f32.mrf.mxu0  ;;  %v4136_v32 = vpop.f32.mrf.mxu1 }
 0x5a4   : > { %v3023_v38 = vsub.f32 %v2810_v20, %v3643_v54  ;;  %v3024_v39 = vsub.f32 %v2880_v29, %v3643_v54 }
 0x5a6   : > { %v3027_v15 = vmul.f32 0.015625, %v3023_v38  ;;  %v3439_v31 = vmul.f32 %v3023_v38, %v3023_v38  ;;  %v3028_v34 = vmul.f32 0.015625, %v3024_v39  ;;  %v3440_v44 = vmul.f32 %v3024_v39, %v3024_v39 }
 0x5a8   : > { %v3415_v17 = vrot.slane %v3027_v15, 4  ;;  %v3443_v19 = vrot.slane %v3439_v31, 4  ;;  %v3421_v57 = vrot.slane %v3028_v34, 4  ;;  %v3449_v1 = vrot.slane %v3440_v44, 4  ;;  %4159 = vmatprep.subr.mxu0 %v3027_v15  ;;  %4167 = vmatprep.subr.mxu1 %v3028_v34 }
 0x5a9   : > { %4160 = vmatpush3.msra.mxu0 %v3027_v15  ;;  %4168 = vmatpush3.msra.mxu1 %v3028_v34 }
 0x5aa   : > { %v3416_v26 = vadd.f32 %v3415_v17, %v3027_v15  ;;  %v3444_v28 = vadd.f32 %v3443_v19, %v3439_v31  ;;  %v3422_v4 = vadd.f32 %v3421_v57, %v3028_v34  ;;  %v3450_v36 = vadd.f32 %v3449_v1, %v3440_v44  ;;  %4162 = vmatmul.mubr.msk.f32.vlgmr.msra.gmra.mxu0 %vm735_vm2, %v4905_v24 }
 0x5ab   : > { %v2949_v45 = vpop.f32.mrf.mxu0  ;;  %4170 = vmatmul.mubr.msk.f32.vlgmr.msra.gmra.mxu1 %vm735_vm2, %v4905_v24  ;;  %4164 = vmatprep.mubr.msk.f32.mxu0 %vm735_vm2, %v4911_v14 }
 0x5ac   : > { %v3417_v35 = vrot.slane %v3416_v26, 2  ;;  %v3445_v41 = vrot.slane %v3444_v28, 2  ;;  %v3423_v0 = vrot.slane %v3422_v4, 2  ;;  %v3451_v46 = vrot.slane %v3450_v36, 2  ;;  %v3019_v47 = vpop.f32.mrf.mxu1  ;;  %4172 = vmatprep.mubr.msk.f32.mxu1 %vm735_vm2, %v4911_v14 }
 0x5ad   : > { %v2950_v48 = vadd.f32 %v2949_v45, %v2731_v8  ;;  %v3020_v37 = vadd.f32 %v3019_v47, %v2735_v27  ;;  %v4147_v52 = vpop.f32.mrf.mxu0 }
 0x5ae   : > { %v3418_v25 = vadd.f32 %v3417_v35, %v3416_v26  ;;  %v3446_v55 = vadd.f32 %v3445_v41, %v3444_v28  ;;  %v3424_v59 = vadd.f32 %v3423_v0, %v3422_v4  ;;  %v3452_v61 = vadd.f32 %v3451_v46, %v3450_v36  ;;  %v4158_v16 = vpop.f32.mrf.mxu1  ;;  %4165 = vmatmul.mubr.msk.f32.gmra.mxu0 %vm735_vm2, %v4921_v22 }
 0x5af   : > { %v3025_v49 = vsub.f32 %v2950_v48, %v3643_v54  ;;  %v3026_v2 = vsub.f32 %v3020_v37, %v3643_v54  ;;  %4173 = vmatmul.mubr.msk.f32.gmra.mxu1 %vm735_vm2, %v4921_v22  ;;  %4177 = vmatprep.mubr.msk.f32.mxu0 %vm735_vm2, %v4884_v62 }
 0x5b0   : > { %v3419_v53 = vrot.slane %v3418_v25, 1  ;;  %v3447_v9 = vrot.slane %v3446_v55, 1  ;;  %v3425_v5 = vrot.slane %v3424_v59, 1  ;;  %v3453_v12 = vrot.slane %v3452_v61, 1  ;;  %4185 = vmatprep.mubr.msk.f32.mxu1 %vm735_vm2, %v4884_v62 }
 0x5b1   : > { %v3029_v40 = vmul.f32 0.015625, %v3025_v49  ;;  %v3441_v13 = vmul.f32 %v3025_v49, %v3025_v49  ;;  %v3030_v42 = vmul.f32 0.015625, %v3026_v2  ;;  %v3442_v43 = vmul.f32 %v3026_v2, %v3026_v2 }
 0x5b2   : > { %v3420_v50 = vadd.f32 %v3419_v53, %v3418_v25  ;;  %v3426_v10 = vadd.f32 %v3425_v5, %v3424_v59  ;;  %v3448_v51 = vadd.f32 %v3447_v9, %v3446_v55  ;;  %v3454_v18 = vadd.f32 %v3453_v12, %v3452_v61 }
 0x5b3   : > { %v3427_v30 = vrot.slane %v3029_v40, 4  ;;  %v3455_v21 = vrot.slane %v3441_v13, 4  ;;  %v3433_v56 = vrot.slane %v3030_v42, 4  ;;  %v3461_v3 = vrot.slane %v3442_v43, 4  ;;  %4175 = vmatprep.subr.mxu0 %v3029_v40  ;;  %4183 = vmatprep.subr.mxu1 %v3030_v42 }
 0x5b4   : > { %v3500_v60 = vadd.f32 %v3426_v10, %v3420_v50  ;;  %4176 = vmatpush3.msra.mxu0 %v3029_v40  ;;  %4184 = vmatpush3.msra.mxu1 %v3030_v42  ;;  %v3472_v62 = vsel %vm3471_vm8, %v3454_v18, %v3448_v51 }
 0x5b5   : > { %v3428_v11 = vadd.f32 %v3427_v30, %v3029_v40  ;;  %v3456_v63 = vadd.f32 %v3455_v21, %v3441_v13  ;;  %v3434_v20 = vadd.f32 %v3433_v56, %v3030_v42  ;;  %v3462_v29 = vadd.f32 %v3461_v3, %v3442_v43  ;;  %4178 = vmatmul.mubr.msk.f32.vlgmr.msra.gmra.mxu0 %vm735_vm2, %v4905_v24 }
 0x5b6   : > { %4186 = vmatmul.mubr.msk.f32.vlgmr.msra.gmra.mxu1 %vm735_vm2, %v4905_v24  ;;  %4180 = vmatprep.mubr.msk.f32.mxu0 %vm735_vm2, %v4911_v14 }
 0x5b7   : > { %v3429_v54 = vrot.slane %v3428_v11, 2  ;;  %v3457_v58 = vrot.slane %v3456_v63, 2  ;;  %v3435_v32 = vrot.slane %v3434_v20, 2  ;;  %v3463_v6 = vrot.slane %v3462_v29, 2  ;;  %4188 = vmatprep.mubr.msk.f32.mxu1 %vm735_vm2, %v4911_v14 }
 0x5b9   : > { %v3430_v33 = vadd.f32 %v3429_v54, %v3428_v11  ;;  %v3458_v38 = vadd.f32 %v3457_v58, %v3456_v63  ;;  %v3436_v39 = vadd.f32 %v3435_v32, %v3434_v20  ;;  %4181 = vmatmul.mubr.msk.f32.gmra.mxu0 %vm735_vm2, %v4921_v22  ;;  %v3464_v15 = vadd.f32 %v3463_v6, %v3462_v29 }
 0x5ba   : > { %4189 = vmatmul.mubr.msk.f32.gmra.mxu1 %vm735_vm2, %v4921_v22 }
 0x5bb   : > { %v3431_v24 = vrot.slane %v3430_v33, 1  ;;  %v3437_v31 = vrot.slane %v3436_v39, 1  ;;  %v3459_v34 = vrot.slane %v3458_v38, 1  ;;  %v3465_v44 = vrot.slane %v3464_v15, 1 }
 0x5bd   : > { %v3432_v14 = vadd.f32 %v3431_v24, %v3430_v33  ;;  %v3460_v23 = vadd.f32 %v3459_v34, %v3458_v38  ;;  %v3466_v7 = vadd.f32 %v3465_v44, %v3464_v15  ;;  %v3438_v17 = vadd.f32 %v3437_v31, %v3436_v39 }
 0x5bf   : > { %v3474_v19 = vsel %vm3473_vm9, %v3460_v23, %v3472_v62  ;;  %v3501_v57 = vadd.f32 %v3500_v60, %v3432_v14 }
 0x5c0   : > { %v3476_v1 = vsel %vm3475_vm10, %v3466_v7, %v3474_v19 }
 0x5c1   : > { %v3479_v26 = vsel %vm3478_vm11, %v3476_v1, 0.0  ;;  %v3502_v28 = vadd.f32 %v3501_v57, %v3438_v17 }
 0x5c2   : > { %3480 = vadd.xlane.f32.xlu1 %v3479_v26 }
 0x5c3   : > { %3503 = vst [vmem:[%s348_s11] sm:$0x1] %v3502_v28 }
 0x64b   : > { %v3481_v4 = vpop.xlane.xlu1 %3480 }
 0x64c   : > { %v3482_v36 = vmul.f32 0.0078125, %v3481_v4 }
 0x64e   : > { %3483 = vst [vmem:[%s340_s15] sm:$0xf] %v3482_v36 }
 0x66a   : > { %v4163_v8 = vpop.f32.mrf.mxu0 }
 0x66b   : > { %v4171_v45 = vpop.f32.mrf.mxu1 }
 0x66c   : > { %v3141_v27 = vpop.f32.mrf.mxu0  ;;  %v3487_v47 = vadd.f32 %v4171_v45, %v4163_v8 }
 0x66d   : > { %v3226_v22 = vpop.f32.mrf.mxu1 }
 0x66e   : > { %v4166_v35 = vpop.f32.mrf.mxu0  ;;  %v3484_v37 = vadd.f32 %v3226_v22, %v3141_v27 }
 0x66f   : > { %v4174_v41 = vpop.f32.mrf.mxu1 }
 0x670   : > { %v3151_v0 = vpop.f32.mrf.mxu0  ;;  %v3493_v59 = vadd.f32 %v4174_v41, %v4166_v35 }
 0x671   : > { %v3236_v46 = vpop.f32.mrf.mxu1 }
 0x672   : > { %v3490_v53 = vadd.f32 %v3236_v46, %v3151_v0 }
 0x675   : > { %v4179_v48 = vpop.f32.mrf.mxu0 }
 0x676   : > { %v3488_v52 = vadd.f32 %v4179_v48, %v3487_v47  ;;  %v4187_v25 = vpop.f32.mrf.mxu1 }
 0x677   : > { %v3311_v55 = vpop.f32.mrf.mxu0 }
 0x678   : > { %v3489_v61 = vadd.f32 %v4187_v25, %v3488_v52  ;;  %v3485_v16 = vadd.f32 %v3484_v37, %v3311_v55  ;;  %v3396_v49 = vpop.f32.mrf.mxu1 }
 0x679   : > { %v4182_v2 = vpop.f32.mrf.mxu0 }
 0x67a   : > { %3497 = vst [vmem:[%s345_s19 + $0x8] sm:$0xff] %v3489_v61  ;;  %v3486_v9 = vadd.f32 %v3485_v16, %v3396_v49  ;;  %v3494_v5 = vadd.f32 %v4182_v2, %v3493_v59  ;;  %v4190_v12 = vpop.f32.mrf.mxu1 }
 0x67b   : > { %v3321_v40 = vpop.f32.mrf.mxu0 }
 0x67c   : > { %3496 = vst [vmem:[%s345_s19] sm:$0xff] %v3486_v9  ;;  %v3495_v13 = vadd.f32 %v4190_v12, %v3494_v5  ;;  %v3491_v42 = vadd.f32 %v3490_v53, %v3321_v40  ;;  %v3406_v43 = vpop.f32.mrf.mxu1 }
 0x67e   : > { %3499 = vst [vmem:[%s345_s19 + $0x18] sm:$0xff] %v3495_v13  ;;  %v3492_v50 = vadd.f32 %v3491_v42, %v3406_v43 }
 0x680   : > { %3498 = vst [vmem:[%s345_s19 + $0x10] sm:$0xff] %v3492_v50 }
 0x681 PF: > { %s19_s27 = sadd.s32 1, %s4210_s27  }
 0x682   : > { %p16_p5 = scmp.ge.s32.totalorder %s19_s27, 4  }
 0x684   :  { %18 = sbr.rel (!%p16_p5) target bundleno = 1 (0x1), region = 101 }

</bundles_post_ra>
